<compile_context>
chip_gen: v6e
topology: v6e:2x2x1
jax: 0.10.0
libtpu: 0.0.40
codegen_flags: <defaults>
</compile_context>

<pallas_src>
import functools

import jax
import jax.numpy as jnp
import numpy as np
from jax import lax
from jax.experimental import pallas as pl
from jax.experimental.pallas import tpu as pltpu


def _round_up(x, m):
    return ((x + m - 1) // m) * m


def _double_conv_kernel(xm_ref, xh_ref, w1_ref, b1_ref, w2_ref, b2_ref, o_ref,
                        *, TH, W, halo, S, pre):
    # xm_ref : (TH*W, K_in)        bf16  main rows of the strip (no duplication in HBM)
    # xh_ref : (2*halo*W, K_in)    bf16  top/bottom halo rows for this strip
    # w1_ref : (K_in, Cmp) if pre else (3, 3*Cip, Cmp)   bf16, BN1 scale pre-folded
    # w2_ref : (3, 3*Cmp, Cop)     bf16, BN2 scale pre-folded
    # b*_ref : (1, C)              f32   folded BN bias
    # o_ref  : (TH*W, Cop)         output strip (flat rows)
    s = pl.program_id(1)
    rows_mid = (TH + 2) * W          # conv1 output rows (incl. 1-row halo for conv2)
    rows_out = TH * W

    # Assemble the logical (TH + 2*halo)-row strip: [top halo | main | bottom halo].
    x_flat = jnp.concatenate(
        [xh_ref[0:halo * W], xm_ref[...], xh_ref[halo * W:2 * halo * W]], axis=0)

    # (rows, 1) boundary-column masks - computed once, reused by both convs.
    col = lax.broadcasted_iota(jnp.int32, (rows_mid, 1), 0) % W
    not_left = (col != 0).astype(jnp.float32)        # kills the w-1 tap at w == 0
    not_right = (col != W - 1).astype(jnp.float32)   # kills the w+1 tap at w == W-1

    def shift_down(p):   # out[r] = p[r-1], row 0 -> 0   (p is a small f32 partial)
        return jnp.concatenate(
            [jnp.zeros((1, p.shape[1]), p.dtype), p[:-1]], axis=0)

    def shift_up(p):     # out[r] = p[r+1], last row -> 0
        return jnp.concatenate(
            [p[1:], jnp.zeros((1, p.shape[1]), p.dtype)], axis=0)

    def conv3x3(x_in, nrows, w_ref):
        # One (nrows, 3*C) patch (three kh row offsets, tile-aligned slices) feeding
        # three K=3*C MXU matmuls (one per kw tap); the +/-1 column shifts are applied
        # to the f32 partial sums, so no shifted input copies are materialized.
        patch = jnp.concatenate(
            [x_in[0:nrows], x_in[W:W + nrows], x_in[2 * W:2 * W + nrows]], axis=1)
        p0 = jnp.dot(patch, w_ref[0], preferred_element_type=jnp.float32)
        p1 = jnp.dot(patch, w_ref[1], preferred_element_type=jnp.float32)
        p2 = jnp.dot(patch, w_ref[2], preferred_element_type=jnp.float32)
        return (not_left[:nrows] * shift_down(p0) + p1 +
                not_right[:nrows] * shift_up(p2))

    # ---- conv1 (BN1 scale folded into the weights) + bias + ReLU ----
    if pre:
        # Wrapper already im2col'ed the tiny-Cin input to K=128 lanes: single matmul.
        y1 = jnp.dot(x_flat, w1_ref[...], preferred_element_type=jnp.float32)
    else:
        y1 = conv3x3(x_flat, rows_mid, w1_ref)
    y1 = jnp.maximum(y1 + b1_ref[...], 0.0)

    # Mid rows outside the image must be exact zeros for conv2's zero padding
    # (not relu(bias)); only the first / last strips have such rows.
    row = lax.broadcasted_iota(jnp.int32, (rows_mid, 1), 0)
    lo = jnp.where(s == 0, W, 0)
    hi = jnp.where(s == S - 1, (TH + 1) * W, rows_mid)
    mid = jnp.where((row >= lo) & (row < hi), y1, 0.0).astype(jnp.bfloat16)

    # ---- conv2 (BN2 scale folded) + bias + ReLU ----
    y2 = conv3x3(mid, rows_out, w2_ref)
    y2 = jnp.maximum(y2 + b2_ref[...], 0.0)
    o_ref[...] = y2.astype(o_ref.dtype)


def _pick_block_h(H, W, K_in, Cmp, Cop, halo, pre, budget_bytes):
    """Largest divisor of H whose per-step VMEM footprint fits the budget."""
    def footprint(th):
        rows_mid = (th + 2) * W
        rows_out = th * W
        rows_in = (th + 2 * halo) * W
        b = 0
        b += 2 * (th * W * K_in * 2)              # main input block (double buffered)
        b += 2 * (2 * halo * W * K_in * 2)        # halo block
        b += 2 * (rows_out * Cop * 4)             # output block
        w1_b = (K_in * Cmp * 2) if pre else (9 * K_in * Cmp * 2)
        b += 2 * (w1_b + 9 * Cmp * Cop * 2)       # grid-invariant weights (2 buffers)
        b += rows_in * K_in * 2                   # assembled strip
        if not pre:
            b += rows_mid * 3 * K_in * 2          # conv1 patch
        b += rows_mid * Cmp * 4 * 2               # conv1 partials / y1
        b += rows_mid * Cmp * 2                   # mid (bf16)
        b += rows_out * 3 * Cmp * 2               # conv2 patch
        b += rows_out * Cop * 4 * 2               # conv2 partials / y2
        return b
    for th in range(H, 0, -1):
        if H % th == 0 and footprint(th) <= budget_bytes:
            return th
    return 1


def double_conv_pallas(x_nchw, w1, g1, be1, rm1, rv1, w2, g2, be2, rm2, rv2,
                       eps=1e-5, block_h=None, out_dtype=jnp.float32):
    """x_nchw: (N, Cin, H, W). w*: (Cout, Cin, 3, 3). Returns (N, Cout, H, W)."""
    N, Cin, H, W = x_nchw.shape
    Cmid, Cout = w1.shape[0], w2.shape[0]
    Cmp, Cop = _round_up(Cmid, 128), _round_up(Cout, 128)

    pre = (9 * Cin) <= 128          # UNet-stem case: im2col conv1 wrapper-side
    halo = 1 if pre else 2          # extra rows needed above/below each output strip
    Cip = _round_up(Cin, 128)
    K_in = 128 if pre else Cip

    # Fold eval-mode BatchNorm: scale into the conv weights, bias kept for the kernel.
    s1 = (g1 / jnp.sqrt(rv1 + eps)).astype(jnp.float32)
    s2 = (g2 / jnp.sqrt(rv2 + eps)).astype(jnp.float32)
    b1 = jnp.pad((be1 - rm1 * s1).astype(jnp.float32), (0, Cmp - Cmid)).reshape(1, Cmp)
    b2 = jnp.pad((be2 - rm2 * s2).astype(jnp.float32), (0, Cop - Cout)).reshape(1, Cop)

    x = jnp.transpose(x_nchw, (0, 2, 3, 1)).astype(jnp.float32)       # NHWC

    if pre:
        # Wrapper-side im2col for tiny Cin: same HBM bytes as padding Cin to 128,
        # ~9x less conv1 MXU work, and no in-kernel taps for conv1.
        xs = jnp.pad(x, ((0, 0), (1, 1), (1, 1), (0, 0)))
        patches = jnp.concatenate(
            [xs[:, dy:dy + H, dx:dx + W, :] for dy in range(3) for dx in range(3)],
            axis=-1)                                                   # (N,H,W,9*Cin)
        x_main4 = jnp.pad(patches, ((0, 0), (0, 0), (0, 0), (0, K_in - 9 * Cin)))
        wt1 = jnp.transpose(w1, (2, 3, 1, 0)) * s1                     # (kh,kw,ci,co)
        wt1 = wt1.reshape(9 * Cin, Cmid)
        w1p = jnp.pad(wt1, ((0, K_in - 9 * Cin), (0, Cmp - Cmid))).astype(jnp.bfloat16)
        w1_spec = pl.BlockSpec((K_in, Cmp), lambda n, s: (0, 0))
    else:
        x_main4 = jnp.pad(x, ((0, 0), (0, 0), (0, 0), (0, Cip - Cin)))
        wt1 = jnp.transpose(w1, (3, 2, 1, 0)) * s1                     # (kw,kh,ci,co)
        wt1 = jnp.pad(wt1, ((0, 0), (0, 0), (0, Cip - Cin), (0, Cmp - Cmid)))
        w1p = wt1.reshape(3, 3 * Cip, Cmp).astype(jnp.bfloat16)
        w1_spec = pl.BlockSpec((3, 3 * Cip, Cmp), lambda n, s: (0, 0, 0))

    wt2 = jnp.transpose(w2, (3, 2, 1, 0)) * s2                         # (kw,kh,ci,co)
    wt2 = jnp.pad(wt2, ((0, 0), (0, 0), (0, Cmp - Cmid), (0, Cop - Cout)))
    w2p = wt2.reshape(3, 3 * Cmp, Cop).astype(jnp.bfloat16)

    # VMEM budget (generation aware: 64 MiB on v7x, 128 MiB on v5e/v6e) drives both the
    # compiler limit and the strip height.
    try:
        vmem_cap = int(pltpu.get_tpu_info().vmem_capacity_bytes)
    except Exception:
        vmem_cap = 64 * 1024 * 1024
    vmem_limit = max(32 * 1024 * 1024, min(int(0.7 * vmem_cap), 100 * 1024 * 1024))
    if block_h is None:
        block_h = _pick_block_h(H, W, K_in, Cmp, Cop, halo, pre, int(0.7 * vmem_limit))
    assert H % block_h == 0, "block_h must divide H"
    TH = block_h
    S = H // TH

    bf = jnp.bfloat16
    x_main = x_main4.reshape(N, H * W, K_in).astype(bf)
    # Tiny halo side-array: 2*halo rows per strip (zero outside the image).  The main
    # input itself is never duplicated / re-read beyond these halo rows.
    xp = jnp.pad(x_main4, ((0, 0), (halo, halo), (0, 0), (0, 0)))
    x_halo = jnp.stack(
        [jnp.concatenate(
            [xp[:, s * TH: s * TH + halo],
             xp[:, (s + 1) * TH + halo: (s + 1) * TH + 2 * halo]], axis=1)
         for s in range(S)], axis=1)                                   # (N,S,2*halo,W,K)
    x_halo = x_halo.reshape(N, S, 2 * halo * W, K_in).astype(bf)

    kernel = functools.partial(_double_conv_kernel, TH=TH, W=W, halo=halo, S=S, pre=pre)

    k1_eff = K_in if pre else 9 * Cip
    flops = 2 * N * H * W * (k1_eff * Cmp + 9 * Cmp * Cop)
    bytes_accessed = int((x_main.size + x_halo.size + w1p.size + w2p.size) * 2 +
                         (b1.size + b2.size) * 4 + N * H * W * Cop * 4)

    out = pl.pallas_call(
        kernel,
        grid=(N, S),
        in_specs=[
            pl.BlockSpec((None, TH * W, K_in), lambda n, s: (n, s, 0)),
            pl.BlockSpec((None, None, 2 * halo * W, K_in), lambda n, s: (n, s, 0, 0)),
            w1_spec,
            pl.BlockSpec((1, Cmp), lambda n, s: (0, 0)),
            pl.BlockSpec((3, 3 * Cmp, Cop), lambda n, s: (0, 0, 0)),
            pl.BlockSpec((1, Cop), lambda n, s: (0, 0)),
        ],
        out_specs=pl.BlockSpec((None, TH * W, Cop), lambda n, s: (n, s, 0)),
        out_shape=jax.ShapeDtypeStruct((N, H * W, Cop), out_dtype),
        compiler_params=pltpu.CompilerParams(
            dimension_semantics=("parallel", "parallel"),
            vmem_limit_bytes=vmem_limit),
        cost_estimate=pl.CostEstimate(flops=flops, transcendentals=0,
                                      bytes_accessed=bytes_accessed),
    )(x_main, x_halo, w1p, b1, w2p, b2)

    out = out.reshape(N, H, W, Cop)[..., :Cout]
    return jnp.transpose(out, (0, 3, 1, 2))           # back to NCHW (module semantics)


def double_conv_ref(x, w1, s1, b1, w2, s2, b2):
    """Pure-JAX f32 reference in NCHW (same folded eval-BN semantics)."""
    dn = ("NCHW", "OIHW", "NCHW")
    y = lax.conv_general_dilated(x, w1, (1, 1), "SAME", dimension_numbers=dn)
    y = jnp.maximum(y * s1[None, :, None, None] + b1[None, :, None, None], 0.0)
    y = lax.conv_general_dilated(y, w2, (1, 1), "SAME", dimension_numbers=dn)
    y = jnp.maximum(y * s2[None, :, None, None] + b2[None, :, None, None], 0.0)
    return y


def _run_case(key, N, Cin, H, W, Cmid, Cout, block_h):
    ks = jax.random.split(key, 11)
    x = jax.random.normal(ks[0], (N, Cin, H, W), jnp.float32)

    w1 = jax.random.normal(ks[1], (Cmid, Cin, 3, 3), jnp.float32) * 0.1
    g1 = 1.0 + 0.1 * jax.random.normal(ks[2], (Cmid,), jnp.float32)
    be1 = 0.1 * jax.random.normal(ks[3], (Cmid,), jnp.float32)
    rm1 = 0.05 * jax.random.normal(ks[4], (Cmid,), jnp.float32)
    rv1 = 1.0 + 0.1 * jax.random.uniform(ks[5], (Cmid,), jnp.float32)

    w2 = jax.random.normal(ks[6], (Cout, Cmid, 3, 3), jnp.float32) * 0.1
    g2 = 1.0 + 0.1 * jax.random.normal(ks[7], (Cout,), jnp.float32)
    be2 = 0.1 * jax.random.normal(ks[8], (Cout,), jnp.float32)
    rm2 = 0.05 * jax.random.normal(ks[9], (Cout,), jnp.float32)
    rv2 = 1.0 + 0.1 * jax.random.uniform(ks[10], (Cout,), jnp.float32)

    out = double_conv_pallas(x, w1, g1, be1, rm1, rv1, w2, g2, be2, rm2, rv2,
                             block_h=block_h)
    out = jax.block_until_ready(out)

    eps = 1e-5
    s1 = g1 / jnp.sqrt(rv1 + eps); b1 = be1 - rm1 * s1
    s2 = g2 / jnp.sqrt(rv2 + eps); b2 = be2 - rm2 * s2
    ref = jax.block_until_ready(double_conv_ref(x, w1, s1, b1, w2, s2, b2))
    np.testing.assert_allclose(np.asarray(out), np.asarray(ref),
                               rtol=5e-2, atol=5e-2)


if __name__ == "__main__":
    key = jax.random.PRNGKey(0)
    k1, k2 = jax.random.split(key)

    # UNet-stem case (tiny Cin -> wrapper-side im2col conv1), 2 row-strips per image
    # (exercises the halo / boundary-zero logic between strips).
    _run_case(k1, N=2, Cin=4, H=16, W=16, Cmid=8, Cout=8, block_h=8)

    # General case (in-kernel 3x3 taps for conv1 too), auto strip height (single strip).
    _run_case(k2, N=1, Cin=16, H=16, W=16, Cmid=16, Cout=16, block_h=None)

    print("KERNEL_OK")
</pallas_src>

<mosaic_0001>
module attributes {stable_mosaic.version = 11 : i64} {
  func.func @_double_conv_kernel(%arg0: i32, %arg1: i32, %arg2: memref<1x128x128xbf16, #tpu.memory_space<vmem>>, %arg3: memref<1x1x32x128xbf16, #tpu.memory_space<vmem>>, %arg4: memref<128x128xbf16, #tpu.memory_space<vmem>>, %arg5: memref<1x128xf32, #tpu.memory_space<vmem>>, %arg6: memref<3x384x128xbf16, #tpu.memory_space<vmem>>, %arg7: memref<1x128xf32, #tpu.memory_space<vmem>>, %arg8: memref<1x128x128xf32, #tpu.memory_space<vmem>>) attributes {dimension_semantics = [#tpu.dimension_semantics<parallel>, #tpu.dimension_semantics<parallel>], iteration_bounds = array<i64: 2, 2>, scalar_prefetch = 0 : i64, scratch_operands = 0 : i64, tpu.core_type = #tpu.core_type<tc>, window_params = [{transform_indices = @transform_0, window_bounds = array<i64: 1, 128, 128>}, {transform_indices = @transform_1, window_bounds = array<i64: 1, 1, 32, 128>}, {pipeline_mode = #tpu.pipeline_mode<synchronous>, transform_indices = @transform_2, window_bounds = array<i64: 128, 128>}, {pipeline_mode = #tpu.pipeline_mode<synchronous>, transform_indices = @transform_3, window_bounds = array<i64: 1, 128>}, {pipeline_mode = #tpu.pipeline_mode<synchronous>, transform_indices = @transform_4, window_bounds = array<i64: 3, 384, 128>}, {pipeline_mode = #tpu.pipeline_mode<synchronous>, transform_indices = @transform_5, window_bounds = array<i64: 1, 128>}, {transform_indices = @transform_6, window_bounds = array<i64: 1, 128, 128>}]} {
    %c0 = arith.constant 0 : index
    %c0_0 = arith.constant 0 : index
    %c0_1 = arith.constant 0 : index
    %c0_2 = arith.constant 0 : index
    %0 = vector.load %arg3[%c0, %c0_0, %c0_1, %c0_2] : memref<1x1x32x128xbf16, #tpu.memory_space<vmem>>, vector<1x1x16x128xbf16>
    %1 = vector.shape_cast %0 : vector<1x1x16x128xbf16> to vector<16x128xbf16>
    %c0_3 = arith.constant 0 : index
    %c0_4 = arith.constant 0 : index
    %c0_5 = arith.constant 0 : index
    %2 = vector.load %arg2[%c0_3, %c0_4, %c0_5] : memref<1x128x128xbf16, #tpu.memory_space<vmem>>, vector<1x128x128xbf16>
    %3 = vector.shape_cast %2 : vector<1x128x128xbf16> to vector<128x128xbf16>
    %c0_6 = arith.constant 0 : index
    %c0_7 = arith.constant 0 : index
    %c16 = arith.constant 16 : index
    %c0_8 = arith.constant 0 : index
    %4 = vector.load %arg3[%c0_6, %c0_7, %c16, %c0_8] : memref<1x1x32x128xbf16, #tpu.memory_space<vmem>>, vector<1x1x16x128xbf16>
    %5 = vector.shape_cast %4 : vector<1x1x16x128xbf16> to vector<16x128xbf16>
    %6 = tpu.concatenate %1, %3, %5 in 0 : vector<16x128xbf16>, vector<128x128xbf16>, vector<16x128xbf16> -> vector<160x128xbf16>
    %7 = tpu.iota {dimensions = array<i32: 0>} : vector<160x1xi32>
    %c16_i32 = arith.constant 16 : i32
    %c0_i32 = arith.constant 0 : i32
    %8 = arith.cmpi eq, %c16_i32, %c0_i32 : i32
    %c1_i32 = arith.constant 1 : i32
    %9 = arith.select %8, %c1_i32, %c16_i32 : i32
    %10 = vector.broadcast %9 : i32 to vector<160x1xi32>
    %11 = arith.remsi %7, %10 : vector<160x1xi32>
    %c0_i32_9 = arith.constant 0 : i32
    %12 = vector.broadcast %c0_i32_9 : i32 to vector<160x1xi32>
    %13 = arith.cmpi ne, %11, %12 : vector<160x1xi32>
    %c0_i32_10 = arith.constant 0 : i32
    %14 = vector.broadcast %c0_i32_10 : i32 to vector<160x1xi32>
    %15 = arith.cmpi slt, %11, %14 : vector<160x1xi32>
    %c0_i32_11 = arith.constant 0 : i32
    %16 = arith.cmpi slt, %9, %c0_i32_11 : i32
    %17 = vector.broadcast %16 : i1 to vector<160x1xi1>
    %18 = vector.broadcast %17 : vector<160x1xi1> to vector<160x1xi1>
    %19 = arith.xori %15, %18 : vector<160x1xi1>
    %20 = arith.andi %19, %13 : vector<160x1xi1>
    %21 = vector.broadcast %9 : i32 to vector<160x1xi32>
    %22 = arith.addi %11, %21 : vector<160x1xi32>
    %23 = arith.select %20, %22, %11 : vector<160x1xi1>, vector<160x1xi32>
    %c0_i32_12 = arith.constant 0 : i32
    %24 = vector.broadcast %c0_i32_12 : i32 to vector<160x1xi32>
    %25 = arith.cmpi ne, %23, %24 : vector<160x1xi32>
    %26 = arith.extui %25 : vector<160x1xi1> to vector<160x1xi32>
    %27 = arith.sitofp %26 : vector<160x1xi32> to vector<160x1xf32>
    %c15_i32 = arith.constant 15 : i32
    %28 = vector.broadcast %c15_i32 : i32 to vector<160x1xi32>
    %29 = arith.cmpi ne, %23, %28 : vector<160x1xi32>
    %30 = arith.extui %29 : vector<160x1xi1> to vector<160x1xi32>
    %31 = arith.sitofp %30 : vector<160x1xi32> to vector<160x1xf32>
    %c0_13 = arith.constant 0 : index
    %c0_14 = arith.constant 0 : index
    %32 = vector.load %arg4[%c0_13, %c0_14] : memref<128x128xbf16, #tpu.memory_space<vmem>>, vector<128x128xbf16>
    %cst = arith.constant dense<0.000000e+00> : vector<160x128xf32>
    %33 = tpu.matmul %6, %32, %cst {dimension_numbers = #tpu.dot_dimension_numbers<[1], [0], [0], [1], [0, 0, 1, 1], [], []>} : vector<160x128xbf16>, vector<128x128xbf16>, vector<160x128xf32> -> vector<160x128xf32>
    %c0_15 = arith.constant 0 : index
    %c0_16 = arith.constant 0 : index
    %34 = vector.load %arg5[%c0_15, %c0_16] : memref<1x128xf32, #tpu.memory_space<vmem>>, vector<1x128xf32>
    %35 = vector.broadcast %34 : vector<1x128xf32> to vector<160x128xf32>
    %36 = arith.addf %33, %35 : vector<160x128xf32>
    %cst_17 = arith.constant 0.000000e+00 : f32
    %37 = vector.broadcast %cst_17 : f32 to vector<160x128xf32>
    %38 = arith.maximumf %36, %37 : vector<160x128xf32>
    %39 = tpu.iota {dimensions = array<i32: 0>} : vector<160x1xi32>
    %c0_i32_18 = arith.constant 0 : i32
    %40 = arith.cmpi eq, %arg1, %c0_i32_18 : i32
    %c16_i32_19 = arith.constant 16 : i32
    %c0_i32_20 = arith.constant 0 : i32
    %41 = arith.select %40, %c16_i32_19, %c0_i32_20 : i32
    %c1_i32_21 = arith.constant 1 : i32
    %42 = arith.cmpi eq, %arg1, %c1_i32_21 : i32
    %c144_i32 = arith.constant 144 : i32
    %c160_i32 = arith.constant 160 : i32
    %43 = arith.select %42, %c144_i32, %c160_i32 : i32
    %44 = vector.broadcast %41 : i32 to vector<160x1xi32>
    %45 = arith.cmpi sge, %39, %44 : vector<160x1xi32>
    %46 = vector.broadcast %43 : i32 to vector<160x1xi32>
    %47 = arith.cmpi slt, %39, %46 : vector<160x1xi32>
    %48 = arith.andi %45, %47 : vector<160x1xi1>
    %cst_22 = arith.constant 0.000000e+00 : f32
    %49 = vector.shape_cast %48 : vector<160x1xi1> to vector<160x1xi1>
    %50 = vector.broadcast %49 : vector<160x1xi1> to vector<160x128xi1>
    %51 = vector.broadcast %cst_22 : f32 to vector<160x128xf32>
    %52 = arith.select %50, %38, %51 : vector<160x128xi1>, vector<160x128xf32>
    %53 = arith.truncf %52 : vector<160x128xf32> to vector<160x128xbf16>
    %54 = vector.extract_strided_slice %53 {offsets = [0, 0], sizes = [128, 128], strides = [1, 1]} : vector<160x128xbf16> to vector<128x128xbf16>
    %55 = vector.extract_strided_slice %53 {offsets = [16, 0], sizes = [128, 128], strides = [1, 1]} : vector<160x128xbf16> to vector<128x128xbf16>
    %56 = vector.extract_strided_slice %53 {offsets = [32, 0], sizes = [128, 128], strides = [1, 1]} : vector<160x128xbf16> to vector<128x128xbf16>
    %57 = tpu.concatenate %54, %55, %56 in 1 : vector<128x128xbf16>, vector<128x128xbf16>, vector<128x128xbf16> -> vector<128x384xbf16>
    %c0_23 = arith.constant 0 : index
    %c0_24 = arith.constant 0 : index
    %c0_25 = arith.constant 0 : index
    %58 = vector.load %arg6[%c0_23, %c0_24, %c0_25] : memref<3x384x128xbf16, #tpu.memory_space<vmem>>, vector<1x384x128xbf16>
    %59 = vector.shape_cast %58 : vector<1x384x128xbf16> to vector<384x128xbf16>
    %cst_26 = arith.constant dense<0.000000e+00> : vector<128x128xf32>
    %60 = tpu.matmul %57, %59, %cst_26 {dimension_numbers = #tpu.dot_dimension_numbers<[1], [0], [0], [1], [0, 0, 1, 1], [], []>} : vector<128x384xbf16>, vector<384x128xbf16>, vector<128x128xf32> -> vector<128x128xf32>
    %c1 = arith.constant 1 : index
    %c0_27 = arith.constant 0 : index
    %c0_28 = arith.constant 0 : index
    %61 = vector.load %arg6[%c1, %c0_27, %c0_28] : memref<3x384x128xbf16, #tpu.memory_space<vmem>>, vector<1x384x128xbf16>
    %62 = vector.shape_cast %61 : vector<1x384x128xbf16> to vector<384x128xbf16>
    %cst_29 = arith.constant dense<0.000000e+00> : vector<128x128xf32>
    %63 = tpu.matmul %57, %62, %cst_29 {dimension_numbers = #tpu.dot_dimension_numbers<[1], [0], [0], [1], [0, 0, 1, 1], [], []>} : vector<128x384xbf16>, vector<384x128xbf16>, vector<128x128xf32> -> vector<128x128xf32>
    %c2 = arith.constant 2 : index
    %c0_30 = arith.constant 0 : index
    %c0_31 = arith.constant 0 : index
    %64 = vector.load %arg6[%c2, %c0_30, %c0_31] : memref<3x384x128xbf16, #tpu.memory_space<vmem>>, vector<1x384x128xbf16>
    %65 = vector.shape_cast %64 : vector<1x384x128xbf16> to vector<384x128xbf16>
    %cst_32 = arith.constant dense<0.000000e+00> : vector<128x128xf32>
    %66 = tpu.matmul %57, %65, %cst_32 {dimension_numbers = #tpu.dot_dimension_numbers<[1], [0], [0], [1], [0, 0, 1, 1], [], []>} : vector<128x384xbf16>, vector<384x128xbf16>, vector<128x128xf32> -> vector<128x128xf32>
    %67 = vector.extract_strided_slice %27 {offsets = [0, 0], sizes = [128, 1], strides = [1, 1]} : vector<160x1xf32> to vector<128x1xf32>
    %cst_33 = arith.constant 0.000000e+00 : f32
    %68 = vector.broadcast %cst_33 : f32 to vector<1x128xf32>
    %69 = vector.extract_strided_slice %60 {offsets = [0, 0], sizes = [127, 128], strides = [1, 1]} : vector<128x128xf32> to vector<127x128xf32>
    %70 = tpu.concatenate %68, %69 in 0 : vector<1x128xf32>, vector<127x128xf32> -> vector<128x128xf32>
    %71 = vector.broadcast %67 : vector<128x1xf32> to vector<128x128xf32>
    %72 = arith.mulf %71, %70 : vector<128x128xf32>
    %73 = arith.addf %72, %63 : vector<128x128xf32>
    %74 = vector.extract_strided_slice %31 {offsets = [0, 0], sizes = [128, 1], strides = [1, 1]} : vector<160x1xf32> to vector<128x1xf32>
    %75 = vector.extract_strided_slice %66 {offsets = [1, 0], sizes = [127, 128], strides = [1, 1]} : vector<128x128xf32> to vector<127x128xf32>
    %cst_34 = arith.constant 0.000000e+00 : f32
    %76 = vector.broadcast %cst_34 : f32 to vector<1x128xf32>
    %77 = tpu.concatenate %75, %76 in 0 : vector<127x128xf32>, vector<1x128xf32> -> vector<128x128xf32>
    %78 = vector.broadcast %74 : vector<128x1xf32> to vector<128x128xf32>
    %79 = arith.mulf %78, %77 : vector<128x128xf32>
    %80 = arith.addf %73, %79 : vector<128x128xf32>
    %c0_35 = arith.constant 0 : index
    %c0_36 = arith.constant 0 : index
    %81 = vector.load %arg7[%c0_35, %c0_36] : memref<1x128xf32, #tpu.memory_space<vmem>>, vector<1x128xf32>
    %82 = vector.broadcast %81 : vector<1x128xf32> to vector<128x128xf32>
    %83 = arith.addf %80, %82 : vector<128x128xf32>
    %cst_37 = arith.constant 0.000000e+00 : f32
    %84 = vector.broadcast %cst_37 : f32 to vector<128x128xf32>
    %85 = arith.maximumf %83, %84 : vector<128x128xf32>
    %c0_38 = arith.constant 0 : index
    %c0_39 = arith.constant 0 : index
    %c0_40 = arith.constant 0 : index
    %86 = vector.load %arg8[%c0_38, %c0_39, %c0_40] : memref<1x128x128xf32, #tpu.memory_space<vmem>>, vector<1x128x128xf32>
    %87 = vector.shape_cast %86 : vector<1x128x128xf32> to vector<128x128xf32>
    %88 = vector.shape_cast %85 : vector<128x128xf32> to vector<1x128x128xf32>
    tpu.vector_store %arg8[%c0_38, %c0_39, %c0_40], %88 {strides = array<i32>} : memref<1x128x128xf32, #tpu.memory_space<vmem>>, vector<1x128x128xf32>,
    return
  }
  func.func @transform_0(%arg0: i32, %arg1: i32) -> (i32, i32, i32) {
    %c0_i32 = arith.constant 0 : i32
    %c0_i32_0 = arith.constant 0 : i32
    return %arg0, %arg1, %c0_i32 : i32, i32, i32
  }
  func.func @transform_1(%arg0: i32, %arg1: i32) -> (i32, i32, i32, i32) {
    %c0_i32 = arith.constant 0 : i32
    %c0_i32_0 = arith.constant 0 : i32
    %c0_i32_1 = arith.constant 0 : i32
    return %arg0, %arg1, %c0_i32, %c0_i32_0 : i32, i32, i32, i32
  }
  func.func @transform_2(%arg0: i32, %arg1: i32) -> (i32, i32) {
    %c0_i32 = arith.constant 0 : i32
    %c0_i32_0 = arith.constant 0 : i32
    %c0_i32_1 = arith.constant 0 : i32
    return %c0_i32, %c0_i32_0 : i32, i32
  }
  func.func @transform_3(%arg0: i32, %arg1: i32) -> (i32, i32) {
    %c0_i32 = arith.constant 0 : i32
    %c0_i32_0 = arith.constant 0 : i32
    %c0_i32_1 = arith.constant 0 : i32
    return %c0_i32, %c0_i32_0 : i32, i32
  }
  func.func @transform_4(%arg0: i32, %arg1: i32) -> (i32, i32, i32) {
    %c0_i32 = arith.constant 0 : i32
    %c0_i32_0 = arith.constant 0 : i32
    %c0_i32_1 = arith.constant 0 : i32
    %c0_i32_2 = arith.constant 0 : i32
    return %c0_i32, %c0_i32_0, %c0_i32_1 : i32, i32, i32
  }
  func.func @transform_5(%arg0: i32, %arg1: i32) -> (i32, i32) {
    %c0_i32 = arith.constant 0 : i32
    %c0_i32_0 = arith.constant 0 : i32
    %c0_i32_1 = arith.constant 0 : i32
    return %c0_i32, %c0_i32_0 : i32, i32
  }
  func.func @transform_6(%arg0: i32, %arg1: i32) -> (i32, i32, i32) {
    %c0_i32 = arith.constant 0 : i32
    %c0_i32_0 = arith.constant 0 : i32
    return %arg0, %arg1, %c0_i32 : i32, i32, i32
  }
}

</mosaic_0001>

<bundles_post_ra>
// kernel: tpu_custom_call.1
= control target key start
LH: loop header
LB: loop body
LE: loop exit
PB: predicated region body
PF: predicated region fallthrough
CT: control target
= control target key end

     0   :  { %s5095_s0 = inlined_call_operand.hbm [shape: bf16[2,256,128], index: 0, kind: input, shape index: {}]   ;;  %s5096_s1 = inlined_call_operand.hbm [shape: bf16[2,2,32,128], index: 1, kind: input, shape index: {}]   ;;  %s5097_s2 = inlined_call_operand.hbm [shape: bf16[128,128], index: 2, kind: input, shape index: {}]   ;;  %s5098_s3 = inlined_call_operand.vmem [shape: f32[1,128], index: 3, kind: input, shape index: {}]   ;;  %s5099_s4 = inlined_call_operand.hbm [shape: bf16[3,384,128], index: 4, kind: input, shape index: {}]   ;;  %s5100_s5 = inlined_call_operand.vmem [shape: f32[1,128], index: 5, kind: input, shape index: {}]   ;;  %s5101_s6 = inlined_call_operand.hbm [shape: f32[2,256,128], index: 6, kind: output, shape index: {}]  }
   0x1   :  { %5117 = sst [smem:[#allocation26_spill]] %s5095_s0 }
   0x2   :  { %5118 = sst [smem:[#allocation27_spill]] %s5097_s2 }
   0x3   :  { %5119 = sst [smem:[#allocation28_spill]] %s5099_s4 }
   0x4   :  { %5120 = sst [smem:[#allocation29_spill]] %s5100_s5 }
   0x5   :  { %5121 = sst [smem:[#allocation30_spill]] %s5101_s6 }
   0x6   :  { %11 = vsyncpa [#allocation3], 0 }
   0x7   :  { %13 = vsyncpa [#allocation3 + $0x1], 0 }
   0x8   :  { %14 = vsyncpa [#allocation6], 0 }
   0x9   :  { %16 = vsyncpa [#allocation6 + $0x1], 0 }
   0xa   :  { %17 = vsyncpa [#allocation9], 0 }
   0xb   :  { %18 = vsyncpa [#allocation4], 0 }
   0xc   :  { %20 = vsyncpa [#allocation4 + $0x1], 0  ;;  %s3855_s21 = smov 0   ;;  %s3857_s22 = smov 0  }
   0xd   :  { %s3859_s23 = smov 0   ;;  %s3861_s24 = smov 0  }
   0xe   :  { %s3863_s25 = smov 0   ;;  %s3865_s26 = smov 0  }
   0xf   :  { %s3867_s27 = smov 0   ;;  %s3869_s28 = smov 0  }
  0x10 LB: > { %5122 = sst [smem:[#allocation16_spill]] %s3780_s21  ;;  %s3896_s29 = sadd.s32 4294967295, %s3808_s28   ;;  %s3808_s28 = sphi %s3869_s28, %s26_s28   ;;  %s3804_s27 = sphi %s3867_s27, %s5226_s27   ;;  %s3800_s26 = sphi %s3865_s26, %s5225_s26   ;;  %s3796_s25 = sphi %s3863_s25, %s5224_s25   ;;  %s3792_s24 = sphi %s3861_s24, %s5223_s24   ;;  %s3788_s23 = sphi %s3859_s23, %s5222_s23   ;;  %s3784_s22 = sphi %s3857_s22, %s5221_s22   ;;  %s3780_s21 = sphi %s3855_s21, %s5220_s21  }
  0x11   : > { %5123 = sst [smem:[#allocation17_spill]] %s3796_s25  ;;  %s2654_s30 = sadd.s32 4294967294, %s3808_s28  }
  0x12   : > { %p60_p0 = scmp.ne.s32.totalorder %s3784_s22, %s3780_s21  ;;  %p61_p1 = scmp.eq.s32.totalorder %s3896_s29, 0 }
  0x13   : > { %p198_p2 = scmp.eq.s32.totalorder %s3896_s29, 3  ;;  %p204_p3 = scmp.eq.s32.totalorder %s2654_s30, 3 }
  0x14   : > { %p3905_p4 = por %p61_p1, %p60_p0  ;;  %p2655_p5 = scmp.ge.s32.totalorder %s3808_s28, 1 }
  0x15   : > { %p3910_p6 = por %p204_p3, %p60_p0  ;;  %p211_p7 = scmp.lt.s32.totalorder %s3808_s28, 5 }
  0x16   : > { %s3810_s10 = smov [#allocation7]   ;;  %s3811_s13 = smov [#allocation8]  }
  0x17   : > { %s5125_s8 = scalar_select %p3910_p6, 1, 0 }
  0x18   : > { %p3915_p8 = pnand %p2655_p5, %p211_p7  ;;  %s223_s11 = sshll.u32 %s3810_s10, 4  ;;  %s224_s11 = int_to_ptr.vmem [resolvable:$true] %s223_s11 }
  0x19   : > { %5126 = sst [smem:[#allocation18_spill]] %s5125_s8  ;;  %s239_s14 = sshll.u32 %s3811_s13, 4  ;;  %s240_s14 = int_to_ptr.vmem [resolvable:$true] %s239_s14 }
  0x1a   : > { %p3407_p9 = pneg %p3915_p8  ;;  %s3603_s15 = scalar_lea.vmem %s224_s11, 1024 }
  0x1b   : > { %p3604_p12 = scmp.ne.s32.totalorder %s224_s11, %s3603_s15  ;;  %p3611_p3 = scmp.lt.s32.totalorder %s224_s11, %s224_s11 }
  0x1c   : > { %p3923_p10 = pnand %p3407_p9, %p61_p1  ;;  %p3612_p5 = scmp.lt.s32.totalorder %s3603_s15, %s3603_s15 }
  0x1e   : > { %p3594_p11 = pneg %p3923_p10  ;;  %p3613_p7 = por %p3612_p5, %p3611_p3 }
  0x20   : > { %p3606_p13 = pnand %p3604_p12, %p3594_p11 }
  0x22   : > { %p3607_p0 = pneg %p3606_p13 }
  0x24   : > { %p3614_p9 = pnand %p3613_p7, %p3607_p0 }
  0x26   : > { %3617 = shalt.err (!%p3614_p9)
}
  0x27   : > { %s5102_s16 = smov 64   ;;  %s5104_s17 = smov 4  }
  0x28   : > { %s5129_s2 = sld [smem:[#allocation27_spill]]  ;;  %s3629_s20 = scalar_lea.vmem %s240_s14, 9216 }
  0x29   : > { %p3630_p12 = scmp.ne.s32.totalorder %s240_s14, %s3629_s20  ;;  %p3637_p0 = scmp.lt.s32.totalorder %s240_s14, %s240_s14 }
  0x2a   : > { %p3638_p5 = scmp.lt.s32.totalorder %s3629_s20, %s3629_s20 }
  0x2b   : > { %p3632_p13 = pnand %p3630_p12, %p3594_p11 }
  0x2c   : > { %p3639_p7 = por %p3638_p5, %p3637_p0 }
  0x2d   : > { %p3633_p3 = pneg %p3632_p13 }
  0x2e   : > { %3410 = dma.hbm_to_vmem [thread:$0]  (!%p3923_p10), %s5129_s2, 1024, %s224_s11, [#allocation6], %s5102_s16, %s5102_s16, %s5104_s17  }
  0x2f   : > { %p3640_p9 = pnand %p3639_p7, %p3633_p3 }
  0x31   : > { %3643 = shalt.err (!%p3640_p9)
}
  0x32   : > { %s5130_s4 = sld [smem:[#allocation28_spill]]  ;;  %s35_s11 = sadd.s32 1, %s3800_s26 }
  0x33   : > { %s38_s12 = sadd.s32 1, %s3804_s27  ;;  %p36_p11 = scmp.ge.s32.totalorder %s35_s11, 2 }
  0x34   : > { %s47_s13 = sadd.s32 1, %s3788_s23  ;;  %p54_p12 = scmp.ne.s32.totalorder %s3788_s23, %s3784_s22 }
  0x35   : > { %p55_p13 = scmp.eq.s32.totalorder %s3808_s28, 0  ;;  %s5228_s11 = smov (%p36_p11, %s35_s11), 0 }
  0x36   : > { %5131 = sst [smem:[#allocation19_spill]] %s5228_s11  ;;  %s5230_s12 = smov (!%p36_p11, %s38_s12), %s3804_s27 }
  0x37   : > { %s43_s15 = ssub.s32 %s3800_s26, %s5228_s11  ;;  %p3962_p3 = por %p55_p13, %p54_p12 }
  0x38   : > { %3413 = dma.hbm_to_vmem [thread:$0]  (!%p3923_p10), %s5130_s4, 9216, %s240_s14, [#allocation9], %s5102_s16, %s5102_s16, %s5104_s17  }
  0x39   : > { %p40_p10 = scmp.ge.s32.totalorder %s5230_s12, 2  ;;  %p3968_p0 = por %p198_p2, %p54_p12 }
  0x3a   : > { %p3427_p5 = scmp.lt.s32.totalorder %s3808_s28, 4  ;;  %s3974_s19 = sand.u32 1, %s3788_s23  }
  0x3b   : > { %s5133_s14 = scalar_select %p3968_p0, 1, 0 }
  0x3c   : > { %s5232_s12 = smov (%p40_p10, %s5230_s12), 0  ;;  %s2659_s20 = sshll.u32 %s3974_s19, 6 }
  0x3d   : > { %5134 = sst [smem:[#allocation20_spill]] %s5133_s14  ;;  %s42_s30 = ssub.s32 %s3804_s27, %s5232_s12 }
  0x3e   : > { %5135 = sst [smem:[#allocation21_spill]] %s5232_s12  ;;  %s44_s10 = sor.u32 %s43_s15, %s42_s30 }
  0x3f   : > { %s2660_s16 = sshll.u32 %s3800_s26, 4  ;;  %p45_p2 = scmp.eq.s32.totalorder %s44_s10, 0 }
  0x40   : > { %s2661_s17 = sshll.u32 %s3804_s27, 5  ;;  %s260_s4 = scalar_lea.vmem [#allocation2], %s2659_s20 }
  0x41   : > { %s266_s2 = sadd.s32 %s2661_s17, %s2660_s16  ;;  %s269_s11 = sshll.u32 %s260_s4, 4  ;;  %s270_s11 = int_to_ptr.vmem [resolvable:$true] %s269_s11 }
  0x42   : > { %s3984_s8 = scalar_select %p45_p2, %s3788_s23, %s47_s13  }
  0x43   : > { %s2662_s21 = sshll.u32 %s266_s2, 6  ;;  %s5137_s0 = sld [smem:[#allocation26_spill]] }
  0x44   : > { %5136 = sst [smem:[#allocation22_spill]] %s3984_s8  ;;  %p3993_p7 = pnand %p3427_p5, %p3962_p3 }
  0x45   : > { %s279_s15 = sand.u32 1, %s3808_s28   ;;  %s2663_s16 = sshll.u32 %s3974_s19, 4 }
  0x46   : > { %s257_s17 = scalar_lea.sflag [#allocation3], %s3974_s19  ;;  %p3646_p9 = pneg %p3993_p7 }
  0x47   : > { %s3657_s4 = scalar_lea.vmem %s270_s11, 1024  ;;  %s3814_s2 = smov [#allocation2]  }
  0x48   : > { %p3658_p11 = scmp.ne.s32.totalorder %s270_s11, %s3657_s4  ;;  %s3662_s6 = sshll.u32 %s3814_s2, 4  ;;  %s3663_s6 = int_to_ptr.vmem [resolvable:$false] %s3662_s6 }
  0x49   : > { %s268_s25 = scalar_lea.hbm %s5137_s0, %s2662_s21  ;;  %s3664_s21 = scalar_lea.vmem %s3663_s6, 2048 }
  0x4a   : > { %p3660_p12 = pnand %p3658_p11, %p3646_p9  ;;  %p3665_p3 = scmp.lt.s32.totalorder %s270_s11, %s3663_s6 }
  0x4b   : > { %p3666_p10 = scmp.lt.s32.totalorder %s3664_s21, %s3657_s4 }
  0x4c   : > { %p3661_p13 = pneg %p3660_p12 }
  0x4d   : > { %p3667_p5 = por %p3666_p10, %p3665_p3 }
  0x4f   : > { %p3668_p2 = pnand %p3667_p5, %p3661_p13 }
  0x51   : > { %3671 = shalt.err (!%p3668_p2)
}
  0x52   : > { %s5139_s13 = smov 4   ;;  %s5140_s18 = smov 64  }
  0x53   : > { %3417 = dma.hbm_to_vmem [thread:$0]  (!%p3993_p7), %s268_s25, 1024, %s270_s11, %s257_s17, %s5140_s18, %s5140_s18, %s5139_s13  }
  0x54   : > { %s2664_s14 = sshll.u32 %s3800_s26, 2  ;;  %s2665_s19 = sshll.u32 %s3804_s27, 3 }
  0x55   : > { %s283_s20 = scalar_lea.vmem [#allocation5], %s2663_s16  ;;  %s289_s10 = sadd.s32 %s2665_s19, %s2664_s14 }
  0x56   : > { %s292_s30 = sshll.u32 %s283_s20, 4  ;;  %s2666_s2 = sshll.u32 %s289_s10, 6  ;;  %s293_s30 = int_to_ptr.vmem [resolvable:$true] %s292_s30 }
  0x57   : > { %s291_s21 = scalar_lea.hbm %s5096_s1, %s2666_s2  ;;  %s280_s0 = scalar_lea.sflag [#allocation6], %s279_s15 }
  0x58   : > { %s3685_s12 = scalar_lea.vmem %s293_s30, 256  ;;  %s3815_s8 = smov [#allocation5]  }
  0x59   : > { %p3686_p11 = scmp.ne.s32.totalorder %s293_s30, %s3685_s12  ;;  %s3690_s25 = sshll.u32 %s3815_s8, 4  ;;  %s3691_s25 = int_to_ptr.vmem [resolvable:$false] %s3690_s25 }
  0x5a   : > { %s3692_s11 = scalar_lea.vmem %s3691_s25, 512  ;;  %p3693_p3 = scmp.lt.s32.totalorder %s293_s30, %s3691_s25 }
  0x5b   : > { %p3688_p12 = pnand %p3686_p11, %p3646_p9  ;;  %p3694_p10 = scmp.lt.s32.totalorder %s3692_s11, %s3685_s12 }
  0x5d   : > { %p3689_p13 = pneg %p3688_p12  ;;  %p3695_p5 = por %p3694_p10, %p3693_p3 }
  0x5f   : > { %p3696_p2 = pnand %p3695_p5, %p3689_p13 }
  0x61   : > { %3699 = shalt.err (!%p3696_p2)
}
  0x62   : > { %3420 = dma.hbm_to_vmem [thread:$0]  (!%p3993_p7), %s291_s21, 256, %s293_s30, %s280_s0, %s5140_s18, %s5140_s18, %s5139_s13  }
  0x63   : > { %304 = sbr.rel (%p3915_p8) target bundleno = 732 (0x2dc), region = 44 }
  0x68   : > { %s4026_s15 = sand.u32 1, %s3784_s22  }
  0x69   : > { %s2668_s8 = sshll.u32 %s4026_s15, 6  ;;  %s307_s12 = scalar_lea.sflag [#allocation3], %s4026_s15 }
  0x6a   : > { %s4030_s16 = scalar_lea.vmem [#allocation2], %s2668_s8 }
  0x6b   : > { %3759 = dma.done.wait (%p3905_p4), %s307_s12, 1024  }
  0x6c   : > { %3761 = vsyncadd (%p3905_p4), %s307_s12, 4294966272  ;;  %s315_s0 = sand.u32 1, %s3896_s29   ;;  %s2669_s5 = sshll.u32 %s4026_s15, 4 }
  0x6d   : > { %s316_s9 = scalar_lea.sflag [#allocation6], %s315_s0  ;;  %s4038_s17 = scalar_lea.vmem [#allocation5], %s2669_s5 }
  0x6e   : > { %3763 = dma.done.wait (%p3905_p4), %s316_s9, 256  }
  0x6f   : > { %3765 = vsyncadd (%p3905_p4), %s316_s9, 4294967040 }
  0x70   : > { %3767 = dma.done.wait (%p61_p1), [#allocation6], 1024  }
  0x71   : > { %3769 = vsyncadd (%p61_p1), [#allocation6], 4294966272 }
  0x72   : > { %3771 = dma.done.wait (%p61_p1), [#allocation9], 9216  }
  0x73   : > { %3773 = vsyncadd (%p61_p1), [#allocation9], 4294958080  ;;  %v3502_v0 = vld [vmem:[#allocation7 + $0x38] sm:$0xff]   ;;  %v3503_v1 = vld [vmem:[#allocation7 + $0x30] sm:$0xff]   ;;  %v444_v44 = vlaneseq  ;;  %p957_p1 = scmp.eq.s32.totalorder %s3792_s24, 0  ;;  %p959_p4 = scmp.eq.s32.totalorder %s3792_s24, 1 }
  0x74   : > { %3261 = vmatprep.subr.bf16.mxu0 %v3502_v0  ;;  %v3504_v2 = vld [vmem:[#allocation7 + $0x28] sm:$0xff]   ;;  %v3505_v3 = vld [vmem:[#allocation7 + $0x20] sm:$0xff]   ;;  %v3506_v5 = vld [vmem:[#allocation7 + $0x18] sm:$0xff]   ;;  %s5202_s20 = sld [smem:[#allocation29_spill]]  ;;  %s2672_s30 = sshll.u32 %s4026_s15, 7 }
  0x75   : > { %3262 = vmatpush3.bf16.msra.mxu0 %v3502_v0  ;;  %v3510_v4 = vld [vmem:[%s4038_s17] sm:$0xff]   ;;  %v3508_v7 = vld [vmem:[#allocation7 + $0x8] sm:$0xff]   ;;  %v3520_v8 = vld [vmem:[#allocation8 + $0x78] sm:$0xff]   ;;  %v4067_v45 = vshrl.u32 %v444_v44, 7  ;;  %s958_s29 = scalar_select %p957_p1, 16, 0 }
  0x76   : > { %3263 = vmatprep.subr.bf16.mxu0 %v3503_v1  ;;  %3277 = vmatprep.mubr.bf16.mxu0 %v3510_v4  ;;  %v3507_v6 = vld [vmem:[#allocation7 + $0x10] sm:$0xff]   ;;  %v3521_v9 = vld [vmem:[#allocation8 + $0x38] sm:$0xff]   ;;  %v3524_v12 = vld [vmem:[#allocation8 + $0x68] sm:$0xff]   ;;  %s960_s7 = scalar_select %p959_p4, 144, 160 }
  0x77   : > { %3021 = vmatprep.subr.bf16.mxu1 %v3520_v8  ;;  %v3522_v10 = vld [vmem:[#allocation8 + $0x70] sm:$0xff]   ;;  %v3509_v13 = vld [vmem:[#allocation7] sm:$0xff]   ;;  %v3525_v14 = vld [vmem:[#allocation8 + $0x28] sm:$0xff]   ;;  %v4070_v46 = vadd.s32 16, %v4067_v45  ;;  %v4073_v47 = vadd.s32 24, %v4067_v45  ;;  %v4075_v48 = vstv %s958_s29  ;;  %v4085_v52 = vadd.s32 8, %v4067_v45 }
  0x78   : > { %3022 = vmatpush3.bf16.msra.mxu1 %v3521_v9  ;;  %v3523_v11 = vld [vmem:[#allocation8 + $0x30] sm:$0xff]   ;;  %v3527_v15 = vld [vmem:[#allocation8 + $0x60] sm:$0xff]   ;;  %v3526_v17 = vld [vmem:[#allocation8 + $0xb8] sm:$0xff]   ;;  %v4077_v49 = vstv %s960_s7  ;;  %vm962_vm4 = vcmp.ge.s32.totalorder %v4067_v45, %v4075_v48  ;;  %v4115_v61 = vadd.s32 32, %v4067_v45  ;;  %v4128_v4 = vadd.s32 48, %v4067_v45  ;;  %s4946_s10 = scalar_lea.vmem [#allocation10], %s2672_s30 }
  0x79   : > { %3264 = vmatpush3.bf16.msra.mxu0 %v3503_v1  ;;  %3023 = vmatprep.subr.bf16.mxu1 %v3522_v10  ;;  %v3511_v16 = vld [vmem:[%s4030_s16] sm:$0xff]   ;;  %v3512_v18 = vld [vmem:[%s4030_s16 + $0x8] sm:$0xff]   ;;  %v3529_v20 = vld [vmem:[#allocation8 + $0xb0] sm:$0xff]   ;;  %vm964_vm0 = vcmp.ge.s32.totalorder %v4070_v46, %v4075_v48  ;;  %vm985_vm1 = vcmp.lt.s32.totalorder %v4070_v46, %v4077_v49  ;;  %vm965_vm2 = vcmp.ge.s32.totalorder %v4073_v47, %v4075_v48  ;;  %v4119_v1 = vadd.s32 40, %v4067_v45  ;;  %s5211_s2 = sld [smem:[#allocation17_spill]]  ;;  %s2998_s4 = sshll.u32 %s3792_s24, 4 }
  0x7a   : > { %3265 = vmatprep.subr.bf16.mxu0 %v3504_v2  ;;  %v3528_v19 = vld [vmem:[#allocation8 + $0x20] sm:$0xff]   ;;  %v3530_v21 = vld [vmem:[#allocation8 + $0x58] sm:$0xff]   ;;  %v3532_v23 = vld [vmem:[#allocation8 + $0xa8] sm:$0xff]   ;;  %vm986_vm3 = vcmp.lt.s32.totalorder %v4073_v47, %v4077_v49  ;;  %vm983_vm5 = vcmp.lt.s32.totalorder %v4067_v45, %v4077_v49  ;;  %vm963_vm7 = vcmp.ge.s32.totalorder %v4085_v52, %v4075_v48  ;;  %vm984_vm8 = vcmp.lt.s32.totalorder %v4085_v52, %v4077_v49  ;;  %s2518_s25 = sshll.u32 %s4946_s10, 4  ;;  %s2503_s5 = scalar_lea.sflag [#allocation4], %s4026_s15  ;;  %s5039_s25 = int_to_ptr.vmem [resolvable:$true] %s2518_s25 }
  0x7b   : > { %v3531_v22 = vld [vmem:[#allocation8 + $0x18] sm:$0xff]   ;;  %v3513_v24 = vld [vmem:[%s4030_s16 + $0x10] sm:$0xff]   ;;  %v3515_v26 = vld [vmem:[%s4030_s16 + $0x20] sm:$0xff]   ;;  %v4133_v8 = vadd.s32 56, %v4067_v45  ;;  %v5147_v10 = vmov 0  ;;  %vm966_vm14 = vcmp.ge.s32.totalorder %v4115_v61, %v4075_v48  ;;  %vm987_vm15 = vcmp.lt.s32.totalorder %v4115_v61, %v4077_v49  ;;  %s3700_s9 = scalar_lea.vmem %s5039_s25, 2048 }
  0x7c   : > { %3024 = vmatpush3.bf16.msra.mxu1 %v3523_v11  ;;  %v3514_v25 = vld [vmem:[%s4030_s16 + $0x18] sm:$0xff]   ;;  %v3516_v27 = vld [vmem:[%s4030_s16 + $0x28] sm:$0xff]   ;;  %v3517_v28 = vld [vmem:[%s4030_s16 + $0x30] sm:$0xff]   ;;  %p3701_p8 = scmp.ne.s32.totalorder %s5039_s25, %s3700_s9 }
  0x7d   : > { %3266 = vmatpush3.bf16.msra.mxu0 %v3504_v2  ;;  %3025 = vmatprep.subr.bf16.mxu1 %v3524_v12  ;;  %v3518_v29 = vld [vmem:[%s4030_s16 + $0x38] sm:$0xff]   ;;  %v3533_v31 = vld [vmem:[#allocation8 + $0x50] sm:$0xff]   ;;  %v3535_v33 = vld [vmem:[#allocation8 + $0xa0] sm:$0xff]   ;;  %s5214_s16 = sld [smem:[#allocation30_spill]] }
  0x7e   : > { %3267 = vmatprep.subr.bf16.mxu0 %v3505_v3  ;;  %v3519_v30 = vld [vmem:[%s4038_s17 + $0x8] sm:$0xff]   ;;  %v3534_v32 = vld [vmem:[#allocation8 + $0x10] sm:$0xff]   ;;  %v3539_v37 = vld [vmem:[#allocation8 + $0x40] sm:$0xff]   ;;  %p3702_p7 = pnand %p3701_p8, %p3968_p0  ;;  %s3817_s17 = smov [#allocation10]  }
  0x7f   : > { %v3536_v34 = vld [vmem:[#allocation8 + $0x48] sm:$0xff]   ;;  %v3538_v36 = vld [vmem:[#allocation8 + $0x98] sm:$0xff]   ;;  %v3540_v38 = vld [vmem:[#allocation8] sm:$0xff]   ;;  %s2999_s6 = sshll.u32 %s5211_s2, 5  ;;  %s3704_s29 = sshll.u32 %s3817_s17, 4  ;;  %s3705_s29 = int_to_ptr.vmem [resolvable:$false] %s3704_s29 }
  0x80   : > { %3026 = vmatpush3.bf16.msra.mxu1 %v3525_v14  ;;  %v3537_v35 = vld [vmem:[#allocation8 + $0x8] sm:$0xff]   ;;  %v3541_v39 = vld [vmem:[#allocation8 + $0x90] sm:$0xff]   ;;  %v3545_v41 = vld [vmem:[#allocation8 + $0x80] sm:$0xff]   ;;  %s2515_s24 = sadd.s32 %s2999_s6, %s2998_s4  ;;  %p3703_p9 = pneg %p3702_p7 }
  0x81   : > { %3268 = vmatpush3.bf16.msra.mxu0 %v3505_v3  ;;  %3027 = vmatprep.subr.bf16.mxu1 %v3527_v15  ;;  %v3543_v40 = vld [vmem:[#allocation8 + $0x88] sm:$0xff]   ;;  %v3542_v42 = vld [vmem:[#allocation8 + $0x138] sm:$0xff]   ;;  %v4082_v51 = vld [vmem:[%s5098_s3] ss:$0 sm:$0xff]  ;;  %s3000_s21 = sshll.u32 %s2515_s24, 7  ;;  %s3706_s7 = scalar_lea.vmem %s3705_s29, 4096 }
  0x82   : > { %3269 = vmatprep.subr.bf16.mxu0 %v3506_v5  ;;  %v4062_v43 = vld [vmem:[#allocation8 + $0x178] sm:$0xff]   ;;  %vm4100_vm6 = vmand %vm964_vm0, %vm985_vm1  ;;  %vm967_vm0 = vcmp.ge.s32.totalorder %v4119_v1, %v4075_v48  ;;  %vm988_vm1 = vcmp.lt.s32.totalorder %v4119_v1, %v4077_v49  ;;  %v3551_v44 = vld [vmem:[#allocation8 + $0xe8] sm:$0xff]   ;;  %p3707_p11 = scmp.lt.s32.totalorder %s5039_s25, %s3705_s29  ;;  %p3708_p12 = scmp.lt.s32.totalorder %s3706_s7, %s3700_s9 }
  0x83   : > { %vm1006_vm9 = vmand %vm965_vm2, %vm986_vm3  ;;  %v3544_v11 = vld [vmem:[#allocation8 + $0xf8] sm:$0xff]   ;;  %vm968_vm2 = vcmp.ge.s32.totalorder %v4128_v4, %v4075_v48  ;;  %vm989_vm3 = vcmp.lt.s32.totalorder %v4128_v4, %v4077_v49  ;;  %s5037_s0 = scalar_lea.hbm %s5214_s16, %s3000_s21 }
  0x84   : > { %3028 = vmatpush3.bf16.msra.mxu1 %v3528_v19  ;;  %vm4110_vm10 = vmand %vm962_vm4, %vm983_vm5  ;;  %vm969_vm5 = vcmp.ge.s32.totalorder %v4133_v8, %v4075_v48  ;;  %p3709_p13 = por %p3708_p12, %p3707_p11 }
  0x85   : > { %3270 = vmatpush3.bf16.msra.mxu0 %v3506_v5  ;;  %3029 = vmatprep.subr.bf16.mxu1 %v3530_v21  ;;  %vm1004_vm11 = vmand %vm963_vm7, %vm984_vm8  ;;  %v3547_v21 = vld [vmem:[#allocation8 + $0xf0] sm:$0xff]  }
  0x86   : > { %3271 = vmatprep.subr.bf16.mxu0 %v3507_v6  ;;  %vm4123_vm12 = vmpackc.low %vm1006_vm9, %vm4100_vm6  ;;  %vm990_vm6 = vcmp.lt.s32.totalorder %v4133_v8, %v4077_v49  ;;  %p3710_p3 = pnand %p3709_p13, %p3703_p9 }
  0x87   : > { %vm4137_vm13 = vmpackc.low %vm1004_vm11, %vm4110_vm10 }
  0x88   : > { %3030 = vmatpush3.bf16.msra.mxu1 %v3531_v22  ;;  %v5148_v10 = vsel %vm4137_vm13, 4294967295, %v5147_v10  ;;  %vm4163_vm4 = vmand %vm966_vm14, %vm987_vm15  ;;  %v4180_v22 = vadd.s32 64, %v4067_v45 }
  0x89   : > { %3272 = vmatpush3.bf16.msra.mxu0 %v3507_v6  ;;  %3031 = vmatprep.subr.bf16.mxu1 %v3533_v31  ;;  %vm4175_vm7 = vmand %vm967_vm0, %vm988_vm1 }
  0x8a   : > { %3273 = vmatprep.subr.bf16.mxu0 %v3508_v7  ;;  %vm4189_vm8 = vmand %vm968_vm2, %vm989_vm3  ;;  %vm970_vm11 = vcmp.ge.s32.totalorder %v4180_v22, %v4075_v48  ;;  %vm991_vm14 = vcmp.lt.s32.totalorder %v4180_v22, %v4077_v49 }
  0x8b   : > { %vm1010_vm9 = vmand %vm969_vm5, %vm990_vm6 }
  0x8c   : > { %3032 = vmatpush3.bf16.msra.mxu1 %v3534_v32  ;;  %v4203_v32 = vadd.s32 88, %v4067_v45  ;;  %vm4210_vm10 = vmpackc.low %vm4175_vm7, %vm4163_vm4 }
  0x8d   : > { %3274 = vmatpush3.bf16.msra.mxu0 %v3508_v7  ;;  %3033 = vmatprep.subr.bf16.mxu1 %v3536_v34  ;;  %vm4223_vm15 = vmpackc.low %vm1010_vm9, %vm4189_vm8 }
  0x8e   : > { %3275 = vmatprep.subr.bf16.mxu0 %v3509_v13  ;;  %vm4250_vm4 = vmand %vm970_vm11, %vm991_vm14  ;;  %vm973_vm5 = vcmp.ge.s32.totalorder %v4203_v32, %v4075_v48  ;;  %vm994_vm6 = vcmp.lt.s32.totalorder %v4203_v32, %v4077_v49 }
  0x8f   : > { %vm4301_vm9 = vmand %vm973_vm5, %vm994_vm6 }
  0x90   : > { %3034 = vmatpush3.bf16.msra.mxu1 %v3537_v35 }
  0x91   : > { %3276 = vmatpush3.bf16.msra.mxu0 %v3509_v13  ;;  %3035 = vmatprep.subr.bf16.mxu1 %v3539_v37  ;;  %v3546_v13 = vld [vmem:[#allocation8 + $0x130] sm:$0xff]  }
  0x92   : > { %3297 = vmatprep.subr.bf16.mxu0 %v3526_v17 }
  0x94   : > { %3278 = vmatmul.mubr.bf16.vlgmr.msra.gmra.mxu0 %v3511_v16  ;;  %3036 = vmatpush3.bf16.msra.mxu1 %v3540_v38 }
  0x95   : > { %3281 = vmatprep.mubr.bf16.mxu0 %v3512_v18  ;;  %3298 = vmatpush3.bf16.msra.mxu0 %v3526_v17 }
  0x96   : > { %3299 = vmatprep.subr.bf16.mxu0 %v3529_v20  ;;  %3101 = vmatprep.subr.bf16.mxu1 %v3542_v42  ;;  %v3549_v42 = vld [vmem:[#allocation8 + $0x170] sm:$0xff]  }
  0x99   : > { %3300 = vmatpush3.bf16.msra.mxu0 %v3529_v20 }
  0x9a   : > { %3301 = vmatprep.subr.bf16.mxu0 %v3532_v23 }
  0x9c   : > { %3282 = vmatmul.mubr.bf16.gmra.mxu0 %v3513_v24  ;;  %v3553_v24 = vld [vmem:[#allocation8 + $0x160] sm:$0xff]  }
  0x9d   : > { %3285 = vmatprep.mubr.bf16.mxu0 %v3514_v25  ;;  %3302 = vmatpush3.bf16.msra.mxu0 %v3532_v23  ;;  %v4194_v25 = vadd.s32 72, %v4067_v45 }
  0x9e   : > { %3303 = vmatprep.subr.bf16.mxu0 %v3535_v33 }
  0x9f   : > { %vm971_vm0 = vcmp.ge.s32.totalorder %v4194_v25, %v4075_v48  ;;  %vm992_vm1 = vcmp.lt.s32.totalorder %v4194_v25, %v4077_v49 }
  0xa0   : > { %vm4270_vm7 = vmand %vm971_vm0, %vm992_vm1 }
  0xa1   : > { %3304 = vmatpush3.bf16.msra.mxu0 %v3535_v33  ;;  %vm4318_vm11 = vmpackc.low %vm4270_vm7, %vm4250_vm4 }
  0xa2   : > { %3305 = vmatprep.subr.bf16.mxu0 %v3538_v36 }
  0xa4   : > { %3286 = vmatmul.mubr.bf16.gmra.mxu0 %v3515_v26  ;;  %v3550_v26 = vld [vmem:[#allocation8 + $0x128] sm:$0xff]  }
  0xa5   : > { %3289 = vmatprep.mubr.bf16.mxu0 %v3516_v27  ;;  %3306 = vmatpush3.bf16.msra.mxu0 %v3538_v36 }
  0xa6   : > { %3307 = vmatprep.subr.bf16.mxu0 %v3541_v39 }
  0xa9   : > { %3308 = vmatpush3.bf16.msra.mxu0 %v3541_v39 }
  0xaa   : > { %3309 = vmatprep.subr.bf16.mxu0 %v3543_v40 }
  0xac   : > { %3290 = vmatmul.mubr.bf16.gmra.mxu0 %v3517_v28 }
  0xad   : > { %3293 = vmatprep.mubr.bf16.mxu0 %v3518_v29  ;;  %3310 = vmatpush3.bf16.msra.mxu0 %v3543_v40  ;;  %v4200_v29 = vadd.s32 80, %v4067_v45 }
  0xae   : > { %3311 = vmatprep.subr.bf16.mxu0 %v3545_v41 }
  0xaf   : > { %vm972_vm2 = vcmp.ge.s32.totalorder %v4200_v29, %v4075_v48  ;;  %vm993_vm3 = vcmp.lt.s32.totalorder %v4200_v29, %v4077_v49 }
  0xb0   : > { %vm4288_vm8 = vmand %vm972_vm2, %vm993_vm3 }
  0xb1   : > { %3312 = vmatpush3.bf16.msra.mxu0 %v3545_v41  ;;  %vm4333_vm1 = vmpackc.low %vm4301_vm9, %vm4288_vm8 }
  0xb2   : > { %3329 = vmatprep.subr.bf16.mxu0 %v4062_v43 }
  0xb4   : > { %3294 = vmatmul.mubr.bf16.gmra.mxu0 %v3519_v30 }
 0x154   : > { %v3279_v50 = vpop.f32.mrf.mxu0 }
 0x155   : > { %v867_v54 = vadd.f32 %v3279_v50, %v4082_v51 }
 0x156   : > { %v858_v53 = vpop.f32.mrf.mxu0 }
 0x157   : > { %v859_v57 = vadd.f32 %v4082_v51, %v858_v53  ;;  %v939_v62 = vmax.f32 %v867_v54, 0.0  ;;  %v3554_v54 = vld [vmem:[#allocation8 + $0x120] sm:$0xff]  }
 0x158   : > { %v3280_v55 = vpop.f32.mrf.mxu0 }
 0x159   : > { %v870_v58 = vadd.f32 %v3280_v55, %v4082_v51  ;;  %v937_v5 = vmax.f32 %v859_v57, 0.0  ;;  %v3563_v57 = vld [vmem:[#allocation8 + $0xd0] sm:$0xff]  }
 0x15a   : > { %v861_v59 = vpop.f32.mrf.mxu0 }
 0x15b   : > { %v940_v63 = vmax.f32 %v870_v58, 0.0  ;;  %v862_v0 = vadd.f32 %v4082_v51, %v861_v59  ;;  %v4275_v58 = vadd.s32 96, %v4067_v45 }
 0x15c   : > { %v3283_v2 = vpop.f32.mrf.mxu0 }
 0x15d   : > { %v4130_v6 = vpack.c.bf16 %v940_v63, %v939_v62  ;;  %v938_v7 = vmax.f32 %v862_v0, 0.0  ;;  %v883_v18 = vadd.f32 %v3283_v2, %v4082_v51  ;;  %v4293_v0 = vadd.s32 104, %v4067_v45 }
 0x15e   : > { %v874_v9 = vpop.f32.mrf.mxu0  ;;  %vm974_vm14 = vcmp.ge.s32.totalorder %v4275_v58, %v4075_v48  ;;  %vm995_vm0 = vcmp.lt.s32.totalorder %v4275_v58, %v4077_v49 }
 0x15f   : > { %v4145_v12 = vpack.c.bf16 %v938_v7, %v937_v5  ;;  %2734 = vmatprep.mubr.msk.bf16.mxu1 %vm4123_vm12, %v4130_v6  ;;  %v875_v15 = vadd.f32 %v4082_v51, %v874_v9  ;;  %v943_v33 = vmax.f32 %v883_v18, 0.0  ;;  %v3552_v5 = vld [vmem:[#allocation8 + $0x168] sm:$0xff]   ;;  %v4306_v7 = vadd.s32 112, %v4067_v45  ;;  %v3555_v9 = vld [vmem:[#allocation8 + $0xe0] sm:$0xff]   ;;  %vm4355_vm6 = vmand %vm974_vm14, %vm995_vm0 }
 0x160   : > { %v3284_v14 = vpop.f32.mrf.mxu0  ;;  %vm975_vm2 = vcmp.ge.s32.totalorder %v4293_v0, %v4075_v48  ;;  %vm996_vm3 = vcmp.lt.s32.totalorder %v4293_v0, %v4077_v49 }
 0x161   : > { %v886_v16 = vadd.f32 %v3284_v14, %v4082_v51  ;;  %2737 = vmatmul.mubr.msk.bf16.vlgmr.msra.gmra.mxu1 %vm4137_vm13, %v4145_v12  ;;  %v941_v30 = vmax.f32 %v875_v15, 0.0  ;;  %v3558_v14 = vld [vmem:[#allocation8 + $0x118] sm:$0xff]   ;;  %vm976_vm4 = vcmp.ge.s32.totalorder %v4306_v7, %v4075_v48  ;;  %vm997_vm5 = vcmp.lt.s32.totalorder %v4306_v7, %v4077_v49  ;;  %vm4375_vm9 = vmand %vm975_vm2, %vm996_vm3 }
 0x162   : > { %v877_v19 = vpop.f32.mrf.mxu0  ;;  %3102 = vmatpush3.bf16.msra.mxu1 %v3544_v11  ;;  %vm4390_vm14 = vmand %vm976_vm4, %vm997_vm5 }
 0x163   : > { %v878_v23 = vadd.f32 %v4082_v51, %v877_v19  ;;  %3103 = vmatprep.subr.bf16.mxu1 %v3546_v13  ;;  %v944_v27 = vmax.f32 %v886_v16, 0.0  ;;  %v4309_v13 = vadd.s32 120, %v4067_v45  ;;  %vm4414_vm2 = vmpackc.low %vm4375_vm9, %vm4355_vm6 }
 0x164   : > { %v3287_v28 = vpop.f32.mrf.mxu0 }
 0x165   : > { %v942_v31 = vmax.f32 %v878_v23, 0.0  ;;  %v899_v34 = vadd.f32 %v3287_v28, %v4082_v51  ;;  %v4231_v40 = vpack.c.bf16 %v944_v27, %v943_v33  ;;  %vm977_vm7 = vcmp.ge.s32.totalorder %v4309_v13, %v4075_v48 }
 0x166   : > { %v890_v35 = vpop.f32.mrf.mxu0  ;;  %3104 = vmatpush3.bf16.msra.mxu1 %v3547_v21  ;;  %vm998_vm8 = vcmp.lt.s32.totalorder %v4309_v13, %v4077_v49 }
 0x167   : > { %v4218_v37 = vpack.c.bf16 %v942_v31, %v941_v30  ;;  %v891_v38 = vadd.f32 %v4082_v51, %v890_v35  ;;  %3105 = vmatprep.subr.bf16.mxu1 %v3550_v26  ;;  %v947_v55 = vmax.f32 %v899_v34, 0.0  ;;  %v3559_v26 = vld [vmem:[#allocation8 + $0xd8] sm:$0xff]   ;;  %v3562_v30 = vld [vmem:[#allocation8 + $0x110] sm:$0xff]   ;;  %v461_v35 = vadd.s32 128, %v4067_v45  ;;  %vm4401_vm0 = vmand %vm977_vm7, %vm998_vm8 }
 0x168   : > { %v3288_v41 = vpop.f32.mrf.mxu0  ;;  %vm4427_vm5 = vmpackc.low %vm4401_vm0, %vm4390_vm14 }
 0x169   : > { %v902_v50 = vadd.f32 %v3288_v41, %v4082_v51  ;;  %2740 = vmatprep.mubr.msk.bf16.mxu1 %vm4210_vm10, %v4218_v37  ;;  %3313 = vmatprep.mubr.msk.bf16.mxu0 %vm4210_vm10, %v4218_v37  ;;  %v945_v59 = vmax.f32 %v891_v38, 0.0  ;;  %vm978_vm3 = vcmp.ge.s32.totalorder %v461_v35, %v4075_v48  ;;  %vm999_vm4 = vcmp.lt.s32.totalorder %v461_v35, %v4077_v49  ;;  %v3560_v35 = vld [vmem:[#allocation8 + $0x148] sm:$0xff]  }
 0x16a   : > { %v893_v56 = vpop.f32.mrf.mxu0  ;;  %2743 = vmatmul.mubr.msk.bf16.gmra.mxu1 %vm4123_vm12, %v4130_v6  ;;  %3314 = vmatmul.mubr.msk.bf16.vlgmr.msra.gmra.mxu0 %vm4223_vm15, %v4231_v40  ;;  %vm4443_vm14 = vmand %vm978_vm3, %vm999_vm4 }
 0x16b   : > { %v948_v60 = vmax.f32 %v902_v50, 0.0  ;;  %v894_v62 = vadd.f32 %v4082_v51, %v893_v56  ;;  %2746 = vmatprep.mubr.msk.bf16.mxu1 %vm4223_vm15, %v4231_v40  ;;  %3330 = vmatpush3.bf16.msra.mxu0 %v4062_v43  ;;  %v462_v50 = vadd.s32 136, %v4067_v45  ;;  %v463_v56 = vadd.s32 144, %v4067_v45 }
 0x16c   : > { %v3291_v2 = vpop.f32.mrf.mxu0  ;;  %3331 = vmatprep.subr.bf16.mxu0 %v3549_v42  ;;  %3106 = vmatpush3.bf16.msra.mxu1 %v3551_v44 }
 0x16d   : > { %v946_v11 = vmax.f32 %v894_v62, 0.0  ;;  %3107 = vmatprep.subr.bf16.mxu1 %v3554_v54  ;;  %v4311_v15 = vpack.c.bf16 %v948_v60, %v947_v55  ;;  %v915_v16 = vadd.f32 %v3291_v2, %v4082_v51  ;;  %v3556_v55 = vld [vmem:[#allocation8 + $0x158] sm:$0xff]   ;;  %v464_v60 = vadd.s32 152, %v4067_v45  ;;  %v3568_v62 = vld [vmem:[#allocation8 + $0x108] sm:$0xff]  }
 0x16e   : > { %v906_v17 = vpop.f32.mrf.mxu0  ;;  %vm979_vm6 = vcmp.ge.s32.totalorder %v462_v50, %v4075_v48  ;;  %vm1000_vm7 = vcmp.lt.s32.totalorder %v462_v50, %v4077_v49  ;;  %vm1001_vm9 = vcmp.lt.s32.totalorder %v463_v56, %v4077_v49  ;;  %vm5187_vm4 = vcmp.ge.s32.totalorder %v463_v56, %v4075_v48  ;;  %v3561_v50 = vld [vmem:[#allocation8 + $0x140] sm:$0xff]   ;;  %v3565_v54 = vld [vmem:[#allocation8 + $0x1b8] sm:$0xff]   ;;  %v3567_v56 = vld [vmem:[#allocation8 + $0x1b0] sm:$0xff]  }
 0x16f   : > { %v4326_v19 = vpack.c.bf16 %v946_v11, %v945_v59  ;;  %v907_v20 = vadd.f32 %v4082_v51, %v906_v17  ;;  %3332 = vmatpush3.bf16.msra.mxu0 %v3549_v42  ;;  %v951_v31 = vmax.f32 %v915_v16, 0.0  ;;  %v3557_v17 = vld [vmem:[#allocation8 + $0x150] sm:$0xff]   ;;  %vm1002_vm8 = vcmp.lt.s32.totalorder %v464_v60, %v4077_v49  ;;  %vm4459_vm3 = vmand %vm979_vm6, %vm1000_vm7 }
 0x170   : > { %v3292_v23 = vpop.f32.mrf.mxu0  ;;  %3333 = vmatprep.subr.bf16.mxu0 %v3552_v5  ;;  %3108 = vmatpush3.bf16.msra.mxu1 %v3555_v9  ;;  %vm1021_vm0 = vmand %vm5187_vm4, %vm1001_vm9  ;;  %vm5188_vm6 = vcmp.ge.s32.totalorder %v464_v60, %v4075_v48  ;;  %v3572_v60 = vld [vmem:[#allocation8 + $0x1e0] sm:$0xff]   ;;  %vm5193_vm9 = vnez %v5148_v10  ;;  %v3590_v10 = vld [vmem:[#allocation8 + $0x208] sm:$0xff]  }
 0x171   : > { %v918_v27 = vadd.f32 %v3292_v23, %v4082_v51  ;;  %3317 = vmatprep.mubr.msk.bf16.mxu0 %vm4318_vm11, %v4326_v19  ;;  %3109 = vmatprep.subr.bf16.mxu1 %v3558_v14  ;;  %v949_v38 = vmax.f32 %v907_v20, 0.0  ;;  %v3569_v20 = vld [vmem:[#allocation8 + $0xc8] sm:$0xff]   ;;  %vm1022_vm7 = vmand %vm5188_vm6, %vm1002_vm8 }
 0x172   : > { %v909_v33 = vpop.f32.mrf.mxu0  ;;  %2749 = vmatmul.mubr.msk.bf16.gmra.mxu1 %vm4210_vm10, %v4218_v37  ;;  %3318 = vmatmul.mubr.msk.bf16.gmra.mxu0 %vm4333_vm1, %v4311_v15  ;;  %vm4481_vm13 = vmpackc.low %vm4459_vm3, %vm4443_vm14 }
 0x173   : > { %v952_v41 = vmax.f32 %v918_v27, 0.0  ;;  %v910_v42 = vadd.f32 %v4082_v51, %v909_v33  ;;  %2752 = vmatprep.mubr.msk.bf16.mxu1 %vm4318_vm11, %v4326_v19  ;;  %3334 = vmatpush3.bf16.msra.mxu0 %v3552_v5  ;;  %vm4487_vm8 = vmpackc.low %vm1022_vm7, %vm1021_vm0  ;;  %vm2366_vm7 = vcmask 1046528  }
 0x174   : > { %v3295_v53 = vpop.f32.mrf.mxu0  ;;  %3335 = vmatprep.subr.bf16.mxu0 %v3553_v24  ;;  %3110 = vmatpush3.bf16.msra.mxu1 %v3559_v26  ;;  %v3574_v26 = vld [vmem:[#allocation8 + $0x100] sm:$0xff]  }
 0x175   : > { %v950_v59 = vmax.f32 %v910_v42, 0.0  ;;  %3111 = vmatprep.subr.bf16.mxu1 %v3562_v30  ;;  %v4407_v63 = vpack.c.bf16 %v952_v41, %v951_v31  ;;  %v931_v2 = vadd.f32 %v3295_v53, %v4082_v51  ;;  %v3580_v41 = vld [vmem:[#allocation8 + $0x238] sm:$0xff]  }
 0x176   : > { %v922_v43 = vpop.f32.mrf.mxu0  ;;  %v3564_v53 = vld [vmem:[#allocation8 + $0x1f8] sm:$0xff]  }
 0x177   : > { %v4420_v9 = vpack.c.bf16 %v950_v59, %v949_v38  ;;  %v923_v11 = vadd.f32 %v4082_v51, %v922_v43  ;;  %3336 = vmatpush3.bf16.msra.mxu0 %v3553_v24  ;;  %v955_v27 = vmax.f32 %v931_v2, 0.0  ;;  %v3575_v38 = vld [vmem:[#allocation8 + $0xc0] sm:$0xff]   ;;  %v3571_v59 = vld [vmem:[#allocation8 + $0x1a8] sm:$0xff]   ;;  %v3576_v2 = vld [vmem:[#allocation8 + $0x1d8] sm:$0xff]  }
 0x178   : > { %v3296_v16 = vpop.f32.mrf.mxu0  ;;  %3337 = vmatprep.subr.bf16.mxu0 %v3556_v55  ;;  %3112 = vmatpush3.bf16.msra.mxu1 %v3563_v57  ;;  %v3570_v57 = vld [vmem:[#allocation8 + $0x1e8] sm:$0xff]   ;;  %v3577_v43 = vld [vmem:[#allocation8 + $0x198] sm:$0xff]   ;;  %v3585_v24 = vld [vmem:[#allocation8 + $0x230] sm:$0xff]  }
 0x179   : > { %v934_v23 = vadd.f32 %v3296_v16, %v4082_v51  ;;  %3321 = vmatprep.mubr.msk.bf16.mxu0 %vm4414_vm2, %v4420_v9  ;;  %3113 = vmatprep.subr.bf16.mxu1 %v3568_v62  ;;  %v953_v31 = vmax.f32 %v923_v11, 0.0  ;;  %v3573_v62 = vld [vmem:[#allocation8 + $0x1a0] sm:$0xff]   ;;  %v3578_v11 = vld [vmem:[#allocation8 + $0x1d0] sm:$0xff]   ;;  %v3588_v30 = vld [vmem:[#allocation8 + $0x218] sm:$0xff]  }
 0x17a   : > { %v925_v28 = vpop.f32.mrf.mxu0  ;;  %2755 = vmatmul.mubr.msk.bf16.gmra.mxu1 %vm4223_vm15, %v4231_v40  ;;  %3322 = vmatmul.mubr.msk.bf16.gmra.mxu0 %vm4427_vm5, %v4407_v63  ;;  %v3579_v16 = vld [vmem:[#allocation8 + $0x190] sm:$0xff]  }
 0x17b   : > { %v956_v33 = vmax.f32 %v934_v23, 0.0  ;;  %v926_v34 = vadd.f32 %v4082_v51, %v925_v28  ;;  %2758 = vmatprep.mubr.msk.bf16.mxu1 %vm4333_vm1, %v4311_v15  ;;  %3338 = vmatpush3.bf16.msra.mxu0 %v3556_v55  ;;  %v3566_v55 = vld [vmem:[#allocation8 + $0x1f0] sm:$0xff]   ;;  %v3583_v23 = vld [vmem:[#allocation8 + $0x1c0] sm:$0xff]  }
 0x17c   : > { %3339 = vmatprep.subr.bf16.mxu0 %v3557_v17  ;;  %3114 = vmatpush3.bf16.msra.mxu1 %v3569_v20  ;;  %v3582_v20 = vld [vmem:[#allocation8 + $0x188] sm:$0xff]   ;;  %v3587_v28 = vld [vmem:[#allocation8 + $0x220] sm:$0xff]  }
 0x17d   : > { %v954_v51 = vmax.f32 %v926_v34, 0.0  ;;  %3115 = vmatprep.subr.bf16.mxu1 %v3574_v26  ;;  %v4475_v42 = vpack.c.bf16 %v956_v33, %v955_v27  ;;  %v3584_v26 = vld [vmem:[#allocation8 + $0x180] sm:$0xff]   ;;  %v3586_v27 = vld [vmem:[#allocation8 + $0x228] sm:$0xff]  }
 0x17f   : > { %v4485_v49 = vpack.c.bf16 %v954_v51, %v953_v31  ;;  %3340 = vmatpush3.bf16.msra.mxu0 %v3557_v17  ;;  %v3581_v17 = vld [vmem:[#allocation8 + $0x1c8] sm:$0xff]   ;;  %v3589_v31 = vld [vmem:[#allocation8 + $0x210] sm:$0xff]  }
 0x180   : > { %3341 = vmatprep.subr.bf16.mxu0 %v3560_v35  ;;  %3116 = vmatpush3.bf16.msra.mxu1 %v3575_v38 }
 0x181   : > { %3325 = vmatprep.mubr.msk.bf16.mxu0 %vm4481_vm13, %v4485_v49  ;;  %3361 = vmatprep.subr.bf16.mxu1 %v3580_v41 }
 0x182   : > { %2761 = vmatmul.mubr.msk.bf16.gmra.mxu1 %vm4318_vm11, %v4326_v19  ;;  %3326 = vmatmul.mubr.msk.bf16.gmra.mxu0 %vm4487_vm8, %v4475_v42 }
 0x183   : > { %2764 = vmatprep.mubr.msk.bf16.mxu1 %vm4414_vm2, %v4420_v9  ;;  %3342 = vmatpush3.bf16.msra.mxu0 %v3560_v35 }
 0x184   : > { %3345 = vmatprep.mubr.msk.bf16.mxu0 %vm4210_vm10, %v4218_v37  ;;  %3343 = vmatprep.subr.bf16.mxu0 %v3561_v50 }
 0x187   : > { %3344 = vmatpush3.bf16.msra.mxu0 %v3561_v50 }
 0x188   : > { %3181 = vmatprep.subr.bf16.mxu0 %v3564_v53 }
 0x18a   : > { %2767 = vmatmul.mubr.msk.bf16.gmra.mxu1 %vm4333_vm1, %v4311_v15  ;;  %3346 = vmatmul.mubr.msk.bf16.vlgmr.msra.gmra.mxu0 %vm4223_vm15, %v4231_v40 }
 0x18b   : > { %2770 = vmatprep.mubr.msk.bf16.mxu1 %vm4427_vm5, %v4407_v63  ;;  %3349 = vmatprep.mubr.msk.bf16.mxu0 %vm4318_vm11, %v4326_v19 }
 0x18c   : > { %3182 = vmatpush3.bf16.msra.mxu0 %v3565_v54 }
 0x18d   : > { %3183 = vmatprep.subr.bf16.mxu0 %v3566_v55 }
 0x190   : > { %3184 = vmatpush3.bf16.msra.mxu0 %v3567_v56 }
 0x191   : > { %3185 = vmatprep.subr.bf16.mxu0 %v3570_v57 }
 0x192   : > { %2773 = vmatmul.mubr.msk.bf16.gmra.mxu1 %vm4414_vm2, %v4420_v9  ;;  %3350 = vmatmul.mubr.msk.bf16.gmra.mxu0 %vm4333_vm1, %v4311_v15 }
 0x193   : > { %2776 = vmatprep.mubr.msk.bf16.mxu1 %vm4481_vm13, %v4485_v49  ;;  %3353 = vmatprep.mubr.msk.bf16.mxu0 %vm4414_vm2, %v4420_v9 }
 0x194   : > { %3186 = vmatpush3.bf16.msra.mxu0 %v3571_v59 }
 0x195   : > { %3187 = vmatprep.subr.bf16.mxu0 %v3572_v60 }
 0x198   : > { %3188 = vmatpush3.bf16.msra.mxu0 %v3573_v62 }
 0x199   : > { %3189 = vmatprep.subr.bf16.mxu0 %v3576_v2 }
 0x19a   : > { %2779 = vmatmul.mubr.msk.bf16.gmra.mxu1 %vm4427_vm5, %v4407_v63  ;;  %3354 = vmatmul.mubr.msk.bf16.gmra.mxu0 %vm4427_vm5, %v4407_v63 }
 0x19b   : > { %2830 = vmatprep.mubr.msk.bf16.mxu1 %vm4123_vm12, %v4130_v6  ;;  %3357 = vmatprep.mubr.msk.bf16.mxu0 %vm4481_vm13, %v4485_v49 }
 0x19c   : > { %3190 = vmatpush3.bf16.msra.mxu0 %v3577_v43 }
 0x19d   : > { %3191 = vmatprep.subr.bf16.mxu0 %v3578_v11 }
 0x1a0   : > { %3192 = vmatpush3.bf16.msra.mxu0 %v3579_v16 }
 0x1a1   : > { %3193 = vmatprep.subr.bf16.mxu0 %v3581_v17 }
 0x1a2   : > { %2833 = vmatmul.mubr.msk.bf16.vlgmr.msra.gmra.mxu1 %vm5193_vm9, %v4145_v12  ;;  %3358 = vmatmul.mubr.msk.bf16.gmra.mxu0 %vm4487_vm8, %v4475_v42 }
 0x1a3   : > { %3362 = vmatpush3.bf16.msra.mxu1 %v3580_v41  ;;  %2836 = vmatprep.mubr.msk.bf16.mxu1 %vm4210_vm10, %v4218_v37 }
 0x1a4   : > { %3194 = vmatpush3.bf16.msra.mxu0 %v3582_v20  ;;  %2926 = vmatprep.mubr.msk.bf16.mxu0 %vm4123_vm12, %v4130_v6 }
 0x1a5   : > { %3195 = vmatprep.subr.bf16.mxu0 %v3583_v23  ;;  %3363 = vmatprep.subr.bf16.mxu1 %v3585_v24 }
 0x1a7   : > { %3364 = vmatpush3.bf16.msra.mxu1 %v3585_v24 }
 0x1a8   : > { %3196 = vmatpush3.bf16.msra.mxu0 %v3584_v26  ;;  %3365 = vmatprep.subr.bf16.mxu1 %v3586_v27 }
 0x1aa   : > { %2839 = vmatmul.mubr.msk.bf16.gmra.mxu1 %vm4123_vm12, %v4130_v6 }
 0x1ab   : > { %2929 = vmatmul.mubr.msk.bf16.vlgmr.msra.gmra.mxu0 %vm5193_vm9, %v4145_v12  ;;  %2842 = vmatprep.mubr.msk.bf16.mxu1 %vm4223_vm15, %v4231_v40  ;;  %v3591_v12 = vld [vmem:[#allocation8 + $0x200] sm:$0xff]  }
 0x1ac   : > { %2932 = vmatprep.mubr.msk.bf16.mxu0 %vm4210_vm10, %v4218_v37  ;;  %3366 = vmatpush3.bf16.msra.mxu1 %v3586_v27 }
 0x1ad   : > { %3367 = vmatprep.subr.bf16.mxu1 %v3587_v28 }
 0x1b0   : > { %3368 = vmatpush3.bf16.msra.mxu1 %v3587_v28 }
 0x1b1   : > { %3369 = vmatprep.subr.bf16.mxu1 %v3588_v30 }
 0x1b2   : > { %2845 = vmatmul.mubr.msk.bf16.gmra.mxu1 %vm4210_vm10, %v4218_v37 }
 0x1b3   : > { %2935 = vmatmul.mubr.msk.bf16.gmra.mxu0 %vm4123_vm12, %v4130_v6  ;;  %2848 = vmatprep.mubr.msk.bf16.mxu1 %vm4318_vm11, %v4326_v19  ;;  %vm2269_vm12 = vcmask 1040384  }
 0x1b4   : > { %2938 = vmatprep.mubr.msk.bf16.mxu0 %vm4223_vm15, %v4231_v40  ;;  %3370 = vmatpush3.bf16.msra.mxu1 %v3588_v30 }
 0x1b5   : > { %3371 = vmatprep.subr.bf16.mxu1 %v3589_v31 }
 0x1b8   : > { %3372 = vmatpush3.bf16.msra.mxu1 %v3589_v31 }
 0x1b9   : > { %3373 = vmatprep.subr.bf16.mxu1 %v3590_v10 }
 0x1ba   : > { %2851 = vmatmul.mubr.msk.bf16.gmra.mxu1 %vm4223_vm15, %v4231_v40 }
 0x1bb   : > { %2941 = vmatmul.mubr.msk.bf16.gmra.mxu0 %vm4210_vm10, %v4218_v37  ;;  %2854 = vmatprep.mubr.msk.bf16.mxu1 %vm4333_vm1, %v4311_v15 }
 0x1bc   : > { %2944 = vmatprep.mubr.msk.bf16.mxu0 %vm4318_vm11, %v4326_v19  ;;  %3374 = vmatpush3.bf16.msra.mxu1 %v3590_v10 }
 0x1bd   : > { %3375 = vmatprep.subr.bf16.mxu1 %v3591_v12 }
 0x1c0   : > { %3376 = vmatpush3.bf16.msra.mxu1 %v3591_v12 }
 0x1c2   : > { %2857 = vmatmul.mubr.msk.bf16.gmra.mxu1 %vm4318_vm11, %v4326_v19 }
 0x1c3   : > { %2947 = vmatmul.mubr.msk.bf16.gmra.mxu0 %vm4223_vm15, %v4231_v40  ;;  %2860 = vmatprep.mubr.msk.bf16.mxu1 %vm4414_vm2, %v4420_v9 }
 0x1c4   : > { %2950 = vmatprep.mubr.msk.bf16.mxu0 %vm4333_vm1, %v4311_v15 }
 0x1ca   : > { %2863 = vmatmul.mubr.msk.bf16.gmra.mxu1 %vm4333_vm1, %v4311_v15 }
 0x1cb   : > { %2953 = vmatmul.mubr.msk.bf16.gmra.mxu0 %vm4318_vm11, %v4326_v19  ;;  %2866 = vmatprep.mubr.msk.bf16.mxu1 %vm4427_vm5, %v4407_v63 }
 0x1cc   : > { %2956 = vmatprep.mubr.msk.bf16.mxu0 %vm4414_vm2, %v4420_v9 }
 0x1d2   : > { %2869 = vmatmul.mubr.msk.bf16.gmra.mxu1 %vm4414_vm2, %v4420_v9 }
 0x1d3   : > { %2959 = vmatmul.mubr.msk.bf16.gmra.mxu0 %vm4333_vm1, %v4311_v15  ;;  %2872 = vmatprep.mubr.msk.bf16.mxu1 %vm4481_vm13, %v4485_v49 }
 0x1d4   : > { %2962 = vmatprep.mubr.msk.bf16.mxu0 %vm4427_vm5, %v4407_v63 }
 0x1da   : > { %2875 = vmatmul.mubr.msk.bf16.gmra.mxu1 %vm4427_vm5, %v4407_v63 }
 0x1db   : > { %2965 = vmatmul.mubr.msk.bf16.gmra.mxu0 %vm4414_vm2, %v4420_v9  ;;  %3377 = vmatprep.mubr.msk.bf16.mxu1 %vm4210_vm10, %v4218_v37 }
 0x1dc   : > { %2968 = vmatprep.mubr.msk.bf16.mxu0 %vm4481_vm13, %v4485_v49 }
 0x1e2   : > { %3378 = vmatmul.mubr.msk.bf16.vlgmr.msra.gmra.mxu1 %vm4223_vm15, %v4231_v40 }
 0x1e3   : > { %2971 = vmatmul.mubr.msk.bf16.gmra.mxu0 %vm4427_vm5, %v4407_v63  ;;  %3381 = vmatprep.mubr.msk.bf16.mxu1 %vm4318_vm11, %v4326_v19 }
 0x1ea   : > { %3382 = vmatmul.mubr.msk.bf16.gmra.mxu1 %vm4333_vm1, %v4311_v15 }
 0x1eb   : > { %3385 = vmatprep.mubr.msk.bf16.mxu1 %vm4414_vm2, %v4420_v9 }
 0x1f2   : > { %3386 = vmatmul.mubr.msk.bf16.gmra.mxu1 %vm4427_vm5, %v4407_v63 }
 0x1f3   : > { %3389 = vmatprep.mubr.msk.bf16.mxu1 %vm4481_vm13, %v4485_v49 }
 0x1fa   : > { %3390 = vmatmul.mubr.msk.bf16.gmra.mxu1 %vm4487_vm8, %v4475_v42 }
 0x221   : > { %v3037_v3 = vpop.f32.mrf.mxu1 }
 0x223   : > { %v3038_v6 = vpop.f32.mrf.mxu1 }
 0x224   : > { %v3039_v36 = vadd.f32 %v3038_v6, %v3037_v3 }
 0x225   : > { %v3040_v37 = vpop.f32.mrf.mxu1 }
 0x227   : > { %v3041_v39 = vpop.f32.mrf.mxu1 }
 0x228   : > { %v3042_v40 = vadd.f32 %v3041_v39, %v3040_v37 }
 0x22a   : > { %v3043_v15 = vpop.f32.mrf.mxu1  ;;  %v3315_v18 = vpop.f32.mrf.mxu0 }
 0x22c   : > { %v3044_v19 = vpop.f32.mrf.mxu1  ;;  %v1416_v21 = vpop.f32.mrf.mxu0 }
 0x22d   : > { %v3045_v5 = vadd.f32 %v3044_v19, %v3043_v15  ;;  %v4662_v63 = vadd.f32 %v3039_v36, %v1416_v21 }
 0x22e   : > { %v3046_v9 = vpop.f32.mrf.mxu1  ;;  %v3316_v14 = vpop.f32.mrf.mxu0 }
 0x22f   : > { %v1425_v33 = vadd.f32 %v3315_v18, %v3045_v5  ;;  %v2270_v49 = vrot.slane %v4662_v63, 7 }
 0x230   : > { %v3047_v34 = vpop.f32.mrf.mxu1  ;;  %v1419_v35 = vpop.f32.mrf.mxu0 }
 0x231   : > { %v3048_v38 = vadd.f32 %v3047_v34, %v3046_v9  ;;  %v1420_v51 = vadd.f32 %v3042_v40, %v1419_v35  ;;  %v2273_v44 = vrot.slane %v1425_v33, 7 }
 0x232   : > { %v3049_v41 = vpop.f32.mrf.mxu1  ;;  %v3319_v42 = vpop.f32.mrf.mxu0 }
 0x233   : > { %v1428_v48 = vadd.f32 %v3316_v14, %v3048_v38  ;;  %v2271_v50 = vrot.slane %v1420_v51, 7 }
 0x234   : > { %v3050_v53 = vpop.f32.mrf.mxu1  ;;  %v1432_v54 = vpop.f32.mrf.mxu0 }
 0x235   : > { %v2275_v55 = vrot.slane %v1428_v48, 7  ;;  %v4666_v56 = vsel %vm2269_vm12, %v2271_v50, %v2273_v44  ;;  %v3051_v57 = vadd.f32 %v3050_v53, %v3049_v41  ;;  %v4671_v59 = vsel %vm2269_vm12, %v2270_v49, %v2271_v50 }
 0x236   : > { %v3052_v60 = vpop.f32.mrf.mxu1  ;;  %v3320_v62 = vpop.f32.mrf.mxu0 }
 0x237   : > { %v1433_v2 = vadd.f32 %v3051_v57, %v1432_v54  ;;  %v4674_v43 = vsel %vm2269_vm12, %v2273_v44, %v2275_v55 }
 0x238   : > { %v3053_v11 = vpop.f32.mrf.mxu1  ;;  %v1435_v16 = vpop.f32.mrf.mxu0 }
 0x239   : > { %v2277_v17 = vrot.slane %v1433_v2, 7  ;;  %v3054_v20 = vadd.f32 %v3053_v11, %v3052_v60 }
 0x23a   : > { %v3055_v23 = vpop.f32.mrf.mxu1  ;;  %v3323_v24 = vpop.f32.mrf.mxu0 }
 0x23b   : > { %v4677_v26 = vsel %vm2269_vm12, %v2275_v55, %v2277_v17  ;;  %v1436_v27 = vadd.f32 %v3054_v20, %v1435_v16 }
 0x23c   : > { %v3056_v28 = vpop.f32.mrf.mxu1  ;;  %v1448_v30 = vpop.f32.mrf.mxu0 }
 0x23d   : > { %v2279_v31 = vrot.slane %v1436_v27, 7  ;;  %v3057_v10 = vadd.f32 %v3056_v28, %v3055_v23 }
 0x23e   : > { %v3058_v12 = vpop.f32.mrf.mxu1  ;;  %v3324_v3 = vpop.f32.mrf.mxu0 }
 0x23f   : > { %v1441_v6 = vadd.f32 %v3319_v42, %v3057_v10  ;;  %v4680_v36 = vsel %vm2269_vm12, %v2277_v17, %v2279_v31 }
 0x240   : > { %v3059_v37 = vpop.f32.mrf.mxu1  ;;  %v1451_v39 = vpop.f32.mrf.mxu0 }
 0x241   : > { %v2281_v40 = vrot.slane %v1441_v6, 7  ;;  %v3060_v15 = vadd.f32 %v3059_v37, %v3058_v12 }
 0x242   : > { %v3061_v18 = vpop.f32.mrf.mxu1  ;;  %v3327_v19 = vpop.f32.mrf.mxu0 }
 0x243   : > { %v1444_v21 = vadd.f32 %v3320_v62, %v3060_v15  ;;  %v4683_v5 = vsel %vm2269_vm12, %v2279_v31, %v2281_v40 }
 0x244   : > { %v3062_v9 = vpop.f32.mrf.mxu1  ;;  %v1464_v14 = vpop.f32.mrf.mxu0 }
 0x245   : > { %v2283_v33 = vrot.slane %v1444_v21, 7  ;;  %v3063_v34 = vadd.f32 %v3062_v9, %v3061_v18 }
 0x246   : > { %v3064_v35 = vpop.f32.mrf.mxu1  ;;  %v3328_v38 = vpop.f32.mrf.mxu0 }
 0x247   : > { %v1449_v51 = vadd.f32 %v3063_v34, %v1448_v30  ;;  %v4686_v41 = vsel %vm2269_vm12, %v2281_v40, %v2283_v33 }
 0x248   : > { %v3065_v42 = vpop.f32.mrf.mxu1  ;;  %v1467_v44 = vpop.f32.mrf.mxu0 }
 0x249   : > { %v2285_v48 = vrot.slane %v1449_v51, 7  ;;  %v3066_v50 = vadd.f32 %v3065_v42, %v3064_v35 }
 0x24a   : > { %v3067_v53 = vpop.f32.mrf.mxu1  ;;  %v4688_v54 = vpop.f32.mrf.mxu0 }
 0x24b   : > { %v1452_v55 = vadd.f32 %v3066_v50, %v1451_v39  ;;  %v4691_v57 = vsel %vm2269_vm12, %v2283_v33, %v2285_v48 }
 0x24c   : > { %v3068_v60 = vpop.f32.mrf.mxu1  ;;  %v1803_v62 = vpop.f32.mrf.mxu0 }
 0x24d   : > { %v2287_v2 = vrot.slane %v1452_v55, 7  ;;  %v3069_v11 = vadd.f32 %v3068_v60, %v3067_v53 }
 0x24e   : > { %v3070_v16 = vpop.f32.mrf.mxu1  ;;  %v4693_v17 = vpop.f32.mrf.mxu0 }
 0x24f   : > { %v1457_v20 = vadd.f32 %v3323_v24, %v3069_v11  ;;  %v4696_v23 = vsel %vm2269_vm12, %v2285_v48, %v2287_v2 }
 0x250   : > { %v3071_v27 = vpop.f32.mrf.mxu1  ;;  %v1806_v28 = vpop.f32.mrf.mxu0 }
 0x251   : > { %v2289_v30 = vrot.slane %v1457_v20, 7  ;;  %v3072_v31 = vadd.f32 %v3071_v27, %v3070_v16 }
 0x252   : > { %v3073_v10 = vpop.f32.mrf.mxu1  ;;  %v4698_v12 = vpop.f32.mrf.mxu0 }
 0x253   : > { %v1460_v6 = vadd.f32 %v3324_v3, %v3072_v31  ;;  %v4701_v37 = vsel %vm2269_vm12, %v2287_v2, %v2289_v30 }
 0x254   : > { %v3074_v39 = vpop.f32.mrf.mxu1  ;;  %v4703_v40 = vpop.f32.mrf.mxu0 }
 0x255   : > { %v2291_v15 = vrot.slane %v1460_v6, 7  ;;  %v3075_v18 = vadd.f32 %v3074_v39, %v3073_v10 }
 0x256   : > { %v3076_v24 = vpop.f32.mrf.mxu1  ;;  %v4705_v21 = vpop.f32.mrf.mxu0 }
 0x257   : > { %v1465_v9 = vadd.f32 %v3075_v18, %v1464_v14  ;;  %v4708_v33 = vsel %vm2269_vm12, %v2289_v30, %v2291_v15  ;;  %v469_v14 = vand.u32 15, %v4067_v45 }
 0x258   : > { %v3077_v34 = vpop.f32.mrf.mxu1  ;;  %v4710_v35 = vpop.f32.mrf.mxu0 }
 0x259   : > { %v2293_v51 = vrot.slane %v1465_v9, 7  ;;  %v3078_v3 = vadd.f32 %v3077_v34, %v3076_v24  ;;  %vm657_vm13 = vcmp.ne.s32.totalorder %v469_v14, 0  ;;  %v5115_v24 = vmov 0.0  }
 0x25a   : > { %v3079_v42 = vpop.f32.mrf.mxu1  ;;  %v4712_v48 = vpop.f32.mrf.mxu0  ;;  %v2683_v9 = vsel %vm657_vm13, 1.0, %v5115_v24 }
 0x25b   : > { %v1468_v50 = vadd.f32 %v3078_v3, %v1467_v44  ;;  %v4715_v53 = vsel %vm2269_vm12, %v2291_v15, %v2293_v51 }
 0x25c   : > { %v3080_v55 = vpop.f32.mrf.mxu1  ;;  %v4717_v60 = vpop.f32.mrf.mxu0 }
 0x25d   : > { %v2295_v2 = vrot.slane %v1468_v50, 7  ;;  %v3081_v11 = vadd.f32 %v3080_v55, %v3079_v42  ;;  %v483_v50 = vand.u32 15, %v4070_v46 }
 0x25e   : > { %v3082_v16 = vpop.f32.mrf.mxu1  ;;  %v4720_v20 = vpop.f32.mrf.mxu0 }
 0x25f   : > { %v1473_v27 = vadd.f32 %v3327_v19, %v3081_v11  ;;  %v4723_v30 = vsel %vm2269_vm12, %v2293_v51, %v2295_v2  ;;  %v2317_v19 = vsel %vm2269_vm12, 0.0, %v2270_v49  ;;  %vm659_vm10 = vcmp.ne.s32.totalorder %v483_v50, 0 }
 0x260   : > { %v3083_v31 = vpop.f32.mrf.mxu1  ;;  %v4725_v10 = vpop.f32.mrf.mxu0  ;;  %v2684_v46 = vsel %vm659_vm10, 1.0, %v5115_v24 }
 0x261   : > { %v2297_v44 = vrot.slane %v1473_v27, 7  ;;  %v3084_v6 = vadd.f32 %v3083_v31, %v3082_v16 }
 0x262   : > { %v3117_v39 = vpop.f32.mrf.mxu1  ;;  %v4727_v15 = vpop.f32.mrf.mxu0 }
 0x263   : > { %v1476_v18 = vadd.f32 %v3328_v38, %v3084_v6  ;;  %v4730_v45 = vsel %vm2269_vm12, %v2295_v2, %v2297_v44  ;;  %v2318_v38 = vmul.f32 %v2683_v9, %v2317_v19  ;;  %v497_v19 = vand.u32 15, %v4115_v61 }
 0x264   : > { %v3118_v34 = vpop.f32.mrf.mxu1  ;;  %v4736_v51 = vpop.f32.mrf.mxu0 }
 0x265   : > { %v2299_v3 = vrot.slane %v1476_v18, 7  ;;  %v3119_v42 = vadd.f32 %v3118_v34, %v3117_v39  ;;  %vm661_vm15 = vcmp.ne.s32.totalorder %v497_v19, 0 }
 0x266   : > { %v3120_v55 = vpop.f32.mrf.mxu1  ;;  %v4739_v14 = vpop.f32.mrf.mxu0  ;;  %v2685_v61 = vsel %vm661_vm15, 1.0, %v5115_v24 }
 0x267   : > { %v1804_v2 = vadd.f32 %v3119_v42, %v1803_v62  ;;  %v4742_v11 = vsel %vm2269_vm12, %v2297_v44, %v2299_v3  ;;  %v2320_v42 = vmul.f32 %v2684_v46, %v4666_v56  ;;  %v511_v46 = vand.u32 15, %v4128_v4 }
 0x268   : > { %v3121_v16 = vpop.f32.mrf.mxu1  ;;  %v4744_v27 = vpop.f32.mrf.mxu0  ;;  %v2322_v19 = vmul.f32 %v2685_v61, %v4677_v26 }
 0x269   : > { %v4746_v63 = vadd.f32 %v2318_v38, %v1804_v2  ;;  %v3122_v49 = vadd.f32 %v3121_v16, %v3120_v55  ;;  %vm663_vm11 = vcmp.ne.s32.totalorder %v511_v46, 0 }
 0x26a   : > { %v3123_v31 = vpop.f32.mrf.mxu1  ;;  %v2686_v4 = vsel %vm663_vm11, 1.0, %v5115_v24 }
 0x26b   : > { %v1807_v6 = vadd.f32 %v3122_v49, %v1806_v28  ;;  %v4748_v39 = vpop.f32.mrf.mxu0  ;;  %v2324_v46 = vmul.f32 %v2686_v4, %v4683_v5 }
 0x26c   : > { %v3124_v18 = vpop.f32.mrf.mxu1 }
 0x26d   : > { %v4752_v9 = vadd.f32 %v4671_v59, %v1807_v6  ;;  %v3125_v62 = vadd.f32 %v3124_v18, %v3123_v31  ;;  %v4754_v44 = vpop.f32.mrf.mxu0 }
 0x26e   : > { %v3126_v34 = vpop.f32.mrf.mxu1 }
 0x26f   : > { %v1812_v3 = vadd.f32 %v4688_v54, %v3125_v62  ;;  %v4759_v50 = vpop.f32.mrf.mxu0 }
 0x270   : > { %v3127_v28 = vpop.f32.mrf.mxu1 }
 0x271   : > { %v4761_v55 = vadd.f32 %v2320_v42, %v1812_v3  ;;  %v3128_v38 = vadd.f32 %v3127_v28, %v3126_v34  ;;  %v4763_v2 = vpop.f32.mrf.mxu0 }
 0x272   : > { %v3129_v59 = vpop.f32.mrf.mxu1 }
 0x273   : > { %v1815_v16 = vadd.f32 %v4693_v17, %v3128_v38  ;;  %v4766_v49 = vpop.f32.mrf.mxu0 }
 0x274   : > { %v3130_v31 = vpop.f32.mrf.mxu1 }
 0x275   : > { %v4770_v54 = vadd.f32 %v4674_v43, %v1815_v16  ;;  %v3131_v56 = vadd.f32 %v3130_v31, %v3129_v59  ;;  %v4772_v6 = vpop.f32.mrf.mxu0  ;;  %v525_v31 = vand.u32 15, %v4180_v22 }
 0x276   : > { %v3132_v18 = vpop.f32.mrf.mxu1 }
 0x277   : > { %v1820_v62 = vadd.f32 %v3131_v56, %v4703_v40  ;;  %v4777_v34 = vpop.f32.mrf.mxu0  ;;  %vm665_vm1 = vcmp.ne.s32.totalorder %v525_v31, 0 }
 0x278   : > { %v3133_v17 = vpop.f32.mrf.mxu1  ;;  %v2687_v22 = vsel %vm665_vm1, 1.0, %v5115_v24 }
 0x279   : > { %v4779_v3 = vadd.f32 %v2322_v19, %v1820_v62  ;;  %v3134_v42 = vadd.f32 %v3133_v17, %v3132_v18  ;;  %v4781_v28 = vpop.f32.mrf.mxu0  ;;  %v2326_v31 = vmul.f32 %v2687_v22, %v4691_v57 }
 0x27a   : > { %v3135_v43 = vpop.f32.mrf.mxu1 }
 0x27b   : > { %v1823_v38 = vadd.f32 %v3134_v42, %v4710_v35  ;;  %v4784_v59 = vpop.f32.mrf.mxu0 }
 0x27c   : > { %v3136_v16 = vpop.f32.mrf.mxu1 }
 0x27d   : > { %v4788_v40 = vadd.f32 %v4680_v36, %v1823_v38  ;;  %v3137_v26 = vadd.f32 %v3136_v16, %v3135_v43  ;;  %v4790_v61 = vpop.f32.mrf.mxu0 }
 0x27e   : > { %v3138_v56 = vpop.f32.mrf.mxu1 }
 0x27f   : > { %v1828_v18 = vadd.f32 %v4698_v12, %v3137_v26  ;;  %v4795_v62 = vpop.f32.mrf.mxu0  ;;  %v539_v26 = vand.u32 15, %v4200_v29  ;;  %v5196_v29 = vmov 0.0  }
 0x280   : > { %v3139_v35 = vpop.f32.mrf.mxu1 }
 0x281   : > { %v4797_v19 = vadd.f32 %v2324_v46, %v1828_v18  ;;  %v3140_v17 = vadd.f32 %v3139_v35, %v3138_v56  ;;  %v4799_v42 = vpop.f32.mrf.mxu0  ;;  %vm667_vm2 = vcmp.ne.s32.totalorder %v539_v26, 0 }
 0x282   : > { %v3141_v36 = vpop.f32.mrf.mxu1 }
 0x283   : > { %v1831_v43 = vadd.f32 %v4705_v21, %v3140_v17  ;;  %v4802_v38 = vpop.f32.mrf.mxu0 }
 0x284   : > { %v3142_v16 = vpop.f32.mrf.mxu1 }
 0x285   : > { %v4806_v12 = vadd.f32 %v4686_v41, %v1831_v43  ;;  %v3143_v5 = vadd.f32 %v3142_v16, %v3141_v36  ;;  %v4808_v4 = vpop.f32.mrf.mxu0  ;;  %v2688_v16 = vsel %vm667_vm2, 1.0, %v5196_v29 }
 0x286   : > { %v3144_v56 = vpop.f32.mrf.mxu1  ;;  %v2328_v26 = vmul.f32 %v2688_v16, %v4701_v37 }
 0x287   : > { %5194 = vst [vmem:[#allocation23_spill] sm:$0xff] %v4806_v12  ;;  %v1836_v18 = vadd.f32 %v3143_v5, %v4717_v60  ;;  %v4813_v46 = vpop.f32.mrf.mxu0  ;;  %v553_v5 = vand.u32 15, %v4275_v58 }
 0x288   : > { %v3145_v21 = vpop.f32.mrf.mxu1 }
 0x289   : > { %v4815_v35 = vadd.f32 %v2326_v31, %v1836_v18  ;;  %v3146_v17 = vadd.f32 %v3145_v21, %v3144_v56  ;;  %v4817_v24 = vpop.f32.mrf.mxu0  ;;  %vm669_vm5 = vcmp.ne.s32.totalorder %v553_v5, 0 }
 0x28a   : > { %v3147_v41 = vpop.f32.mrf.mxu1  ;;  %v2689_v58 = vsel %vm669_vm5, 1.0, %v5196_v29 }
 0x28b   : > { %5195 = vst [vmem:[#allocation24_spill] sm:$0xff] %v4815_v35  ;;  %v1839_v36 = vadd.f32 %v3146_v17, %v4725_v10  ;;  %v4820_v43 = vpop.f32.mrf.mxu0  ;;  %v2330_v5 = vmul.f32 %v2689_v58, %v4715_v53 }
 0x28c   : > { %v3148_v12 = vpop.f32.mrf.mxu1 }
 0x28d   : > { %v4824_v60 = vadd.f32 %v4696_v23, %v1839_v36  ;;  %v3149_v57 = vadd.f32 %v3148_v12, %v3147_v41  ;;  %v4826_v22 = vpop.f32.mrf.mxu0 }
 0x28e   : > { %v3150_v56 = vpop.f32.mrf.mxu1 }
 0x28f   : > { %5197 = vst [vmem:[#allocation25_spill] sm:$0xff] %v4824_v60  ;;  %v1844_v18 = vadd.f32 %v4712_v48, %v3149_v57  ;;  %v4831_v31 = vpop.f32.mrf.mxu0  ;;  %v567_v57 = vand.u32 15, %v4306_v7 }
 0x290   : > { %v3151_v10 = vpop.f32.mrf.mxu1 }
 0x291   : > { %v4833_v21 = vadd.f32 %v2328_v26, %v1844_v18  ;;  %v3152_v17 = vadd.f32 %v3151_v10, %v3150_v56  ;;  %v4835_v35 = vpop.f32.mrf.mxu0  ;;  %vm671_vm14 = vcmp.ne.s32.totalorder %v567_v57, 0 }
 0x292   : > { %v3153_v23 = vpop.f32.mrf.mxu1 }
 0x293   : > { %v1847_v12 = vadd.f32 %v4720_v20, %v3152_v17  ;;  %v4838_v41 = vpop.f32.mrf.mxu0 }
 0x294   : > { %v3154_v36 = vpop.f32.mrf.mxu1 }
 0x295   : > { %v4842_v48 = vadd.f32 %v4708_v33, %v1847_v12  ;;  %v3155_v37 = vadd.f32 %v3154_v36, %v3153_v23  ;;  %v4844_v16 = vpop.f32.mrf.mxu0  ;;  %v2690_v12 = vsel %vm671_vm14, 1.0, %v5196_v29 }
 0x296   : > { %v3156_v56 = vpop.f32.mrf.mxu1 }
 0x297   : > { %v1852_v18 = vadd.f32 %v3155_v37, %v4736_v51  ;;  %v4849_v26 = vpop.f32.mrf.mxu0 }
 0x298   : > { %v3157_v20 = vpop.f32.mrf.mxu1 }
 0x299   : > { %v4851_v10 = vadd.f32 %v2330_v5, %v1852_v18  ;;  %v3158_v17 = vadd.f32 %v3157_v20, %v3156_v56  ;;  %v4853_v60 = vpop.f32.mrf.mxu0  ;;  %v2332_v56 = vmul.f32 %v2690_v12, %v4730_v45  ;;  %v518_v45 = vand.u32 15, %v4133_v8 }
 0x29a   : > { %v3159_v33 = vpop.f32.mrf.mxu1  ;;  %v3214_v8 = vadd.f32 %v4799_v42, %v4795_v62 }
 0x29b   : > { %v1855_v23 = vadd.f32 %v3158_v17, %v4744_v27  ;;  %v4860_v51 = vpop.f32.mrf.mxu0  ;;  %v476_v17 = vand.u32 15, %v4085_v52  ;;  %vm712_vm6 = vcmp.ne.s32.totalorder %v518_v45, 15 }
 0x29c   : > { %v3160_v7 = vpop.f32.mrf.mxu1 }
 0x29d   : > { %v4858_v36 = vadd.f32 %v4723_v30, %v1855_v23  ;;  %v3161_v53 = vadd.f32 %v3160_v7, %v3159_v33  ;;  %v4866_v57 = vpop.f32.mrf.mxu0  ;;  %v490_v30 = vand.u32 15, %v4073_v47  ;;  %v504_v23 = vand.u32 15, %v4119_v1 }
 0x29e   : > { %v3162_v58 = vpop.f32.mrf.mxu1  ;;  %v3205_v33 = vadd.f32 %v4772_v6, %v4766_v49  ;;  %v3199_v7 = vadd.f32 %v4754_v44, %v4748_v39  ;;  %vm706_vm0 = vcmp.ne.s32.totalorder %v476_v17, 15  ;;  %v532_v6 = vand.u32 15, %v4194_v25 }
 0x29f   : > { %v1860_v37 = vadd.f32 %v4727_v15, %v3161_v53  ;;  %v3208_v53 = vadd.f32 %v4781_v28, %v4777_v34  ;;  %vm4884_vm3 = vcmp.ne.s32.totalorder %v490_v30, 15  ;;  %vm4888_vm4 = vcmp.ne.s32.totalorder %v504_v23, 15 }
 0x2a0   : > { %v3163_v18 = vpop.f32.mrf.mxu1  ;;  %v546_v34 = vand.u32 15, %v4203_v32  ;;  %v2693_v25 = vsel %vm4888_vm4, 1.0, %v5196_v29  ;;  %v4908_v32 = vsel %vm712_vm6, 1.0, %v5196_v29  ;;  %v3217_v17 = vadd.f32 %v4808_v4, %v4802_v38 }
 0x2a1   : > { %v4864_v5 = vadd.f32 %v2332_v56, %v1860_v37  ;;  %v3164_v27 = vadd.f32 %v3163_v18, %v3162_v58  ;;  %v4879_v58 = vpop.f32.mrf.mxu0  ;;  %v2691_v18 = vsel %vm706_vm0, 1.0, %v5196_v29  ;;  %vm714_vm8 = vcmp.ne.s32.totalorder %v532_v6, 15 }
 0x2a2   : > { %v3379_v20 = vpop.f32.mrf.mxu1  ;;  %vm4922_vm9 = vcmp.ne.s32.totalorder %v546_v34, 15  ;;  %v574_v49 = vand.u32 15, %v4309_v13 }
 0x2a3   : > { %v1863_v15 = vadd.f32 %v4739_v14, %v3164_v27  ;;  %v2199_v52 = vadd.f32 %v3379_v20, %v3205_v33  ;;  %v3202_v14 = vadd.f32 %v4763_v2, %v4759_v50  ;;  %v4896_v28 = vpop.f32.mrf.mxu0  ;;  %v3211_v50 = vadd.f32 %v4790_v61, %v4784_v59  ;;  %v4916_v59 = vld [vmem:[%s5202_s20] ss:$0 sm:$0xff] }
 0x2a4   : > { %v2190_v12 = vpop.f32.mrf.mxu1  ;;  %v2692_v20 = vsel %vm4884_vm3, 1.0, %v5196_v29  ;;  %v3220_v33 = vadd.f32 %v4817_v24, %v4813_v46  ;;  %vm4950_vm12 = vcmp.ne.s32.totalorder %v574_v49, 15 }
 0x2a5   : > { %v4882_v47 = vadd.f32 %v4742_v11, %v1863_v15  ;;  %v2191_v39 = vadd.f32 %v3199_v7, %v2190_v12  ;;  %v2370_v37 = vrot.slane %v2199_v52, 1  ;;  %v4926_v38 = vpop.f32.mrf.mxu0 }
 0x2a6   : > { %v3380_v1 = vpop.f32.mrf.mxu1 }
 0x2a7   : > { %v2202_v44 = vadd.f32 %v3380_v1, %v3208_v53  ;;  %v2367_v30 = vrot.slane %v2191_v39, 1  ;;  %v3240_v13 = vpop.f32.mrf.mxu0 }
 0x2a8   : > { %v2193_v11 = vpop.f32.mrf.mxu1 }
 0x2a9   : > { %v2372_v56 = vrot.slane %v2202_v44, 1  ;;  %v2194_v27 = vadd.f32 %v3202_v14, %v2193_v11  ;;  %v4936_v44 = vsel %vm714_vm8, 1.0, %v5196_v29 }
 0x2aa   : > { %v3383_v2 = vpop.f32.mrf.mxu1 }
 0x2ab   : > { %v2373_v23 = vsel %vm2366_vm7, %v2370_v37, %v2372_v56  ;;  %v2368_v61 = vrot.slane %v2194_v27, 1  ;;  %v2215_v53 = vadd.f32 %v3383_v2, %v3217_v17 }
 0x2ac   : > { %v2433_v15 = vadd.f32 %v2373_v23, %v4761_v55  ;;  %v2206_v45 = vpop.f32.mrf.mxu1  ;;  %v3229_v23 = vadd.f32 %v4844_v16, %v4838_v41 }
 0x2ad   : > { %v2369_v4 = vsel %vm2366_vm7, %v2367_v30, %v2368_v61  ;;  %v2371_v7 = vsel %vm2366_vm7, %v2368_v61, %v2370_v37  ;;  %v2207_v52 = vadd.f32 %v3211_v50, %v2206_v45 }
 0x2ae   : > { %v2456_v1 = vadd.f32 %v4916_v59, %v2433_v15  ;;  %v2416_v24 = vmul.f32 %v2691_v18, %v2371_v7  ;;  %v2431_v46 = vadd.f32 %v2369_v4, %v4746_v63  ;;  %v3384_v55 = vpop.f32.mrf.mxu1  ;;  %v4943_v63 = vsel %vm4922_vm9, 1.0, %v5196_v29  ;;  %v3242_v7 = vpop.f32.mrf.mxu0 }
 0x2af   : > { %v2374_v14 = vrot.slane %v2207_v52, 1  ;;  %v2218_v39 = vadd.f32 %v3384_v55, %v3220_v33  ;;  %v2378_v18 = vrot.slane %v2215_v53, 1  ;;  %v3232_v15 = vadd.f32 %v4853_v60, %v4849_v26 }
 0x2b0   : > { %v2472_v11 = vmax.f32 %v2456_v1, 0.0  ;;  %v2432_v6 = vadd.f32 %v2416_v24, %v4752_v9  ;;  %v2454_v34 = vadd.f32 %v4916_v59, %v2431_v46  ;;  %v2209_v37 = vpop.f32.mrf.mxu1  ;;  %v560_v46 = vand.u32 15, %v4293_v0 }
 0x2b1   : > { %v2375_v62 = vsel %vm2366_vm7, %v2372_v56, %v2374_v14  ;;  %v2380_v42 = vrot.slane %v2218_v39, 1  ;;  %v2210_v27 = vadd.f32 %v3214_v8, %v2209_v37  ;;  %v3223_v56 = vadd.f32 %v4826_v22, %v4820_v43 }
 0x2b2   : > { %2488 = vst [vmem:[%s4946_s10 + $0x10] sm:$0xff] %v2472_v11  ;;  %v2455_v9 = vadd.f32 %v4916_v59, %v2432_v6  ;;  %v2470_v50 = vmax.f32 %v2454_v34, 0.0  ;;  %v2418_v2 = vmul.f32 %v2692_v20, %v2375_v62  ;;  %v3387_v17 = vpop.f32.mrf.mxu1  ;;  %v3241_v62 = vadd.f32 %v3240_v13, %v4926_v38  ;;  %v5208_v13 = vld [vmem:[#allocation24_spill] sm:$0xff] }
 0x2b3   : > { %v2381_v61 = vsel %vm2366_vm7, %v2378_v18, %v2380_v42  ;;  %v2376_v33 = vrot.slane %v2210_v27, 1  ;;  %v2231_v22 = vadd.f32 %v3387_v17, %v3229_v23  ;;  %vm4999_vm13 = vcmp.ne.s32.totalorder %v560_v46, 15 }
 0x2b4   : > { %v2471_v45 = vmax.f32 %v2455_v9, 0.0  ;;  %2486 = vst [vmem:[%s4946_s10] sm:$0xff] %v2470_v50  ;;  %v2434_v20 = vadd.f32 %v2418_v2, %v4770_v54  ;;  %v2437_v12 = vadd.f32 %v2381_v61, %v4797_v19  ;;  %v2222_v4 = vpop.f32.mrf.mxu1  ;;  %v3226_v19 = vadd.f32 %v4835_v35, %v4831_v31  ;;  %v5207_v2 = vld [vmem:[#allocation23_spill] sm:$0xff] }
 0x2b5   : > { %v2377_v53 = vsel %vm2366_vm7, %v2374_v14, %v2376_v33  ;;  %v2379_v43 = vsel %vm2366_vm7, %v2376_v33, %v2378_v18  ;;  %v2223_v41 = vadd.f32 %v3223_v56, %v2222_v4  ;;  %v2386_v11 = vrot.slane %v2231_v22, 1 }
 0x2b6   : > { %2487 = vst [vmem:[%s4946_s10 + $0x8] sm:$0xff] %v2471_v45  ;;  %v2457_v16 = vadd.f32 %v4916_v59, %v2434_v20  ;;  %v2460_v52 = vadd.f32 %v4916_v59, %v2437_v12  ;;  %v2420_v60 = vmul.f32 %v2693_v25, %v2379_v43  ;;  %v2435_v26 = vadd.f32 %v2377_v53, %v4779_v3  ;;  %v3388_v54 = vpop.f32.mrf.mxu1  ;;  %v3243_v25 = vpop.f32.mrf.mxu0  ;;  %v5212_v43 = vld [vmem:[#allocation25_spill] sm:$0xff] }
 0x2b7   : > { %v2382_v1 = vrot.slane %v2223_v41, 1  ;;  %v2234_v24 = vadd.f32 %v3388_v54, %v3232_v15  ;;  %v3235_v18 = vadd.f32 %v4866_v57, %v4860_v51  ;;  %v3244_v9 = vadd.f32 %v3243_v25, %v3242_v7 }
 0x2b8   : > { %v2473_v55 = vmax.f32 %v2457_v16, 0.0  ;;  %v2476_v49 = vmax.f32 %v2460_v52, 0.0  ;;  %v2436_v8 = vadd.f32 %v2420_v60, %v4788_v40  ;;  %v2458_v14 = vadd.f32 %v4916_v59, %v2435_v26  ;;  %v2225_v39 = vpop.f32.mrf.mxu1 }
 0x2b9   : > { %v2383_v3 = vsel %vm2366_vm7, %v2380_v42, %v2382_v1  ;;  %v2388_v6 = vrot.slane %v2234_v24, 1  ;;  %v2226_v34 = vadd.f32 %v3226_v19, %v2225_v39  ;;  %v2698_v40 = vsel %vm4950_vm12, 1.0, %v5196_v29 }
 0x2ba   : > { %2489 = vst [vmem:[%s4946_s10 + $0x18] sm:$0xff] %v2473_v55  ;;  %2492 = vst [vmem:[%s4946_s10 + $0x30] sm:$0xff] %v2476_v49  ;;  %v2459_v35 = vadd.f32 %v4916_v59, %v2436_v8  ;;  %v2474_v31 = vmax.f32 %v2458_v14, 0.0  ;;  %v2422_v0 = vmul.f32 %v4908_v32, %v2383_v3  ;;  %v3391_v37 = vpop.f32.mrf.mxu1  ;;  %v2697_v24 = vsel %vm4999_vm13, 1.0, %v5196_v29 }
 0x2bb   : > { %v2389_v42 = vsel %vm2366_vm7, %v2386_v11, %v2388_v6  ;;  %v2384_v27 = vrot.slane %v2226_v34, 1  ;;  %v2247_v61 = vadd.f32 %v3391_v37, %v3241_v62 }
 0x2bc   : > { %v2475_v50 = vmax.f32 %v2459_v35, 0.0  ;;  %2490 = vst [vmem:[%s4946_s10 + $0x20] sm:$0xff] %v2474_v31  ;;  %v2438_v17 = vadd.f32 %v2422_v0, %v5207_v2  ;;  %v2441_v32 = vadd.f32 %v2389_v42, %v4833_v21  ;;  %v2238_v56 = vpop.f32.mrf.mxu1  ;;  %v3238_v21 = vadd.f32 %v4896_v28, %v4879_v58 }
 0x2bd   : > { %v2385_v30 = vsel %vm2366_vm7, %v2382_v1, %v2384_v27  ;;  %v2387_v23 = vsel %vm2366_vm7, %v2384_v27, %v2386_v11  ;;  %v2239_v33 = vadd.f32 %v3235_v18, %v2238_v56  ;;  %v2394_v16 = vrot.slane %v2247_v61, 1 }
 0x2be   : > { %2491 = vst [vmem:[%s4946_s10 + $0x28] sm:$0xff] %v2475_v50  ;;  %v2461_v51 = vadd.f32 %v4916_v59, %v2438_v17  ;;  %v2464_v57 = vadd.f32 %v4916_v59, %v2441_v32  ;;  %v2424_v38 = vmul.f32 %v4936_v44, %v2387_v23  ;;  %v2439_v15 = vadd.f32 %v2385_v30, %v5208_v13  ;;  %v3392_v45 = vpop.f32.mrf.mxu1 }
 0x2bf   : > { %v2390_v20 = vrot.slane %v2239_v33, 1  ;;  %v2250_v12 = vadd.f32 %v3392_v45, %v3244_v9 }
 0x2c0   : > { %v2477_v7 = vmax.f32 %v2461_v51, 0.0  ;;  %v2480_v53 = vmax.f32 %v2464_v57, 0.0  ;;  %v2440_v44 = vadd.f32 %v2424_v38, %v5212_v43  ;;  %v2462_v22 = vadd.f32 %v4916_v59, %v2439_v15  ;;  %v2241_v41 = vpop.f32.mrf.mxu1 }
 0x2c1   : > { %v2391_v52 = vsel %vm2366_vm7, %v2388_v6, %v2390_v20  ;;  %v2396_v58 = vrot.slane %v2250_v12, 1  ;;  %v2242_v28 = vadd.f32 %v3238_v21, %v2241_v41 }
 0x2c2   : > { %2493 = vst [vmem:[%s4946_s10 + $0x38] sm:$0xff] %v2477_v7  ;;  %2496 = vst [vmem:[%s4946_s10 + $0x50] sm:$0xff] %v2480_v53  ;;  %v2463_v60 = vadd.f32 %v4916_v59, %v2440_v44  ;;  %v2478_v26 = vmax.f32 %v2462_v22, 0.0  ;;  %v2426_v54 = vmul.f32 %v4943_v63, %v2391_v52 }
 0x2c3   : > { %v2397_v19 = vsel %vm2366_vm7, %v2394_v16, %v2396_v58  ;;  %v2414_v1 = vsel %vm2366_vm7, %v2396_v58, 0.0  ;;  %v2392_v46 = vrot.slane %v2242_v28, 1 }
 0x2c4   : > { %v2479_v55 = vmax.f32 %v2463_v60, 0.0  ;;  %2494 = vst [vmem:[%s4946_s10 + $0x40] sm:$0xff] %v2478_v26  ;;  %v2442_v49 = vadd.f32 %v2426_v54, %v4842_v48  ;;  %v2430_v8 = vmul.f32 %v2698_v40, %v2414_v1  ;;  %v2445_v14 = vadd.f32 %v2397_v19, %v4864_v5 }
 0x2c5   : > { %v2393_v63 = vsel %vm2366_vm7, %v2390_v20, %v2392_v46  ;;  %v2395_v39 = vsel %vm2366_vm7, %v2392_v46, %v2394_v16 }
 0x2c6   : > { %2495 = vst [vmem:[%s4946_s10 + $0x48] sm:$0xff] %v2479_v55  ;;  %v2465_v25 = vadd.f32 %v4916_v59, %v2442_v49  ;;  %v2446_v29 = vadd.f32 %v2430_v8, %v4882_v47  ;;  %v2468_v11 = vadd.f32 %v4916_v59, %v2445_v14  ;;  %v2428_v3 = vmul.f32 %v2697_v24, %v2395_v39 }
 0x2c7   : > { %v2443_v48 = vadd.f32 %v2393_v63, %v4851_v10 }
 0x2c8   : > { %v2481_v6 = vmax.f32 %v2465_v25, 0.0  ;;  %v2469_v5 = vadd.f32 %v4916_v59, %v2446_v29  ;;  %v2484_v34 = vmax.f32 %v2468_v11, 0.0  ;;  %v2444_v35 = vadd.f32 %v2428_v3, %v4858_v36 }
 0x2c9   : > { %v2466_v47 = vadd.f32 %v4916_v59, %v2443_v48 }
 0x2ca   : > { %2497 = vst [vmem:[%s4946_s10 + $0x58] sm:$0xff] %v2481_v6  ;;  %v2485_v31 = vmax.f32 %v2469_v5, 0.0  ;;  %2500 = vst [vmem:[%s4946_s10 + $0x70] sm:$0xff] %v2484_v34  ;;  %v2467_v0 = vadd.f32 %v4916_v59, %v2444_v35 }
 0x2cb   : > { %v2482_v10 = vmax.f32 %v2466_v47, 0.0 }
 0x2cc   : > { %2501 = vst [vmem:[%s4946_s10 + $0x78] sm:$0xff] %v2485_v31  ;;  %v2483_v36 = vmax.f32 %v2467_v0, 0.0 }
 0x2cd   : > { %2498 = vst [vmem:[%s4946_s10 + $0x60] sm:$0xff] %v2482_v10 }
 0x2ce   : > { %2499 = vst [vmem:[%s4946_s10 + $0x68] sm:$0xff] %v2483_v36 }
 0x2cf   : > { %3713 = shalt.err (!%p3710_p3)
}
 0x2d0   : > { %s3714_s13 = scalar_lea.hbm %s5037_s0, 2048  ;;  %s3718_s19 = scalar_lea.hbm %s5214_s16, 8192 }
 0x2d1   : > { %p3715_p10 = scmp.ne.s32.totalorder %s5037_s0, %s3714_s13  ;;  %p3719_p1 = scmp.lt.s32.totalorder %s5037_s0, %s5214_s16 }
 0x2d2   : > { %p3720_p4 = scmp.lt.s32.totalorder %s3718_s19, %s3714_s13 }
 0x2d3   : > { %p3716_p5 = pnand %p3715_p10, %p3968_p0 }
 0x2d4   : > { %p3721_p8 = por %p3720_p4, %p3719_p1 }
 0x2d5   : > { %p3717_p2 = pneg %p3716_p5 }
 0x2d7   : > { %p3722_p7 = pnand %p3721_p8, %p3717_p2 }
 0x2d9   : > { %3725 = shalt.err (!%p3722_p7)
}
 0x2da   : > { %s3818_s10 = smov 128   ;;  %s3819_s2 = smov 8  }
 0x2db   : > { %3405 = dma.vmem_to_hbm [thread:$0]  (%p3968_p0), %s5039_s25, 2048, %s5037_s0, %s2503_s5, %s3818_s10, %s3818_s10, %s3819_s2  }
 0x2dc PF: > { %s5215_s4 = sld [smem:[#allocation16_spill]]  ;;  %p3430_p9 = scmp.ge.s32.totalorder %s3808_s28, 2 }
 0x2de   : > { %p3422_p11 = pnand %p3430_p9, %p3910_p6 }
 0x2e0   : > { %p3423_p12 = pneg %p3422_p11 }
 0x2e2   : > { %s2533_s24 = sand.u32 1, %s5215_s4  }
 0x2e3   : > { %s2534_s21 = scalar_lea.sflag [#allocation4], %s2533_s24 }
 0x2e4   : > { %3775 = dma.done.wait (%p3423_p12), %s2534_s21, 2048  }
 0x2e5   : > { %3777 = vsyncadd (%p3423_p12), %s2534_s21, 4294965248  ;;  %s26_s28 = sadd.s32 1, %s3808_s28   ;;  %s5217_s11 = sld [smem:[#allocation22_spill]] }
 0x2e6   : > { %p23_p13 = scmp.ge.s32.totalorder %s26_s28, 6   ;;  %s5218_s15 = sld [smem:[#allocation19_spill]] }
 0x2e7   : > { %s5219_s8 = sld [smem:[#allocation21_spill]]  ;;  %s5220_s21 = smov %s3784_s22 }
 0x2e8   : > { %s5221_s22 = smov %s3788_s23  ;;  %s5223_s24 = smov %s3800_s26 }
 0x2e9   : > { %s5224_s25 = smov %s3804_s27  ;;  %25 = sbr.rel (!%p23_p13) target bundleno = 16 (0x10), region = 112 }
 0x2eb   : > { %s5222_s23 = smov %s5217_s11 }
 0x2ec   : > { %s5225_s26 = smov %s5218_s15 }
 0x2ed   : > { %s5226_s27 = smov %s5219_s8 }
 0x2ee   :  { %2539 = vsyncpa [#allocation3], 1 }
 0x2ef   :  { %2541 = vsyncpa [#allocation3 + $0x1], 1 }
 0x2f0   :  { %2542 = vsyncpa [#allocation6], 1 }
 0x2f1   :  { %2544 = vsyncpa [#allocation6 + $0x1], 1 }
 0x2f2   :  { %2545 = vsyncpa [#allocation9], 1 }
 0x2f3   :  { %2546 = vsyncpa [#allocation4], 1 }
 0x2f4   :  { %2548 = vsyncpa [#allocation4 + $0x1], 1 }

</bundles_post_ra>
